<compile_context>
chip_gen: v6e
topology: v6e:2x2x1
jax: 0.10.0
libtpu: 0.0.40
codegen_flags: <defaults>
</compile_context>

<pallas_src>
import jax
import jax.numpy as jnp
from jax.experimental import pallas as pl
from jax.experimental.pallas import tpu as pltpu


# ----------------------------- kernel --------------------------------------
def _ae_kernel(x_ref,
               w1_ref, b1_ref,
               w23_ref, b23_ref,
               w4_ref, b4_ref,
               o_ref):
    # x tile is f32 [TB, D_in] (DMA'd once from HBM); cast to bf16 in VMEM so
    # the MXU runs bf16 inputs with f32 accumulation.  Biases are f32; all
    # bias-add / ReLU / sigmoid work stays in f32 (v5e VPU/EUP have no bf16).
    x = x_ref[...].astype(jnp.bfloat16)

    # encoder layer 1 + ReLU
    h1 = jnp.dot(x, w1_ref[...], preferred_element_type=jnp.float32) + b1_ref[...]
    h1 = jnp.maximum(h1, 0.0)

    # fused (encoder layer 2 @ decoder layer 1) + ReLU
    h2 = jnp.dot(h1.astype(jnp.bfloat16), w23_ref[...],
                 preferred_element_type=jnp.float32) + b23_ref[...]
    h2 = jnp.maximum(h2, 0.0)

    # decoder layer 2 + Sigmoid
    y = jnp.dot(h2.astype(jnp.bfloat16), w4_ref[...],
                preferred_element_type=jnp.float32) + b4_ref[...]
    o_ref[...] = jax.nn.sigmoid(y).astype(o_ref.dtype)


# ----------------------------- wrapper --------------------------------------
def autoencoder_forward(x, kparams, *, block_b=512, out_dtype=jnp.bfloat16):
    """x: [B, D_in] float32.  kparams: output of prepare_kernel_params().
    Returns [B, D_in] reconstruction in `out_dtype` (default bfloat16)."""
    B, D = x.shape
    w1, b1 = kparams["w1"], kparams["b1"]
    w23, b23 = kparams["w23"], kparams["b23"]
    w4, b4 = kparams["w4"], kparams["b4"]
    H = w1.shape[1]

    # Effective tile: never larger than the (sublane-aligned) batch, always a
    # multiple of 8 so the (8, 128) tiling constraint holds on the batch axis.
    tb = min(block_b, max(8, ((B + 7) // 8) * 8))
    tb = max(8, (tb // 8) * 8)
    num_tiles = int(pl.cdiv(B, tb))
    Bp = num_tiles * tb
    if Bp != B:
        # Only pads (and later slices) when B is not a multiple of the tile.
        x = jnp.pad(x, ((0, Bp - B), (0, 0)))

    row_spec = lambda shape: pl.BlockSpec(shape, lambda i: (i, 0))   # batch-tiled
    resident = lambda shape: pl.BlockSpec(shape, lambda i: (0, 0))   # stays in VMEM

    bytes_per = jnp.dtype  # noqa: E731  (readability below)
    weight_bytes = (w1.size + w23.size + w4.size) * 2 + (b1.size + b23.size + b4.size) * 4
    cost = pl.CostEstimate(
        flops=2 * Bp * (D * H + H * H + H * D),
        transcendentals=Bp * D,                       # sigmoid
        bytes_accessed=Bp * D * 4                      # x (f32 in)
                       + Bp * D * jnp.dtype(out_dtype).itemsize   # out
                       + weight_bytes,
    )

    out = pl.pallas_call(
        _ae_kernel,
        out_shape=jax.ShapeDtypeStruct((Bp, D), out_dtype),
        grid=(num_tiles,),
        in_specs=[
            row_spec((tb, D)),
            resident(w1.shape), resident(b1.shape),
            resident(w23.shape), resident(b23.shape),
            resident(w4.shape), resident(b4.shape),
        ],
        out_specs=row_spec((tb, D)),
        compiler_params=pltpu.CompilerParams(
            dimension_semantics=("parallel",)),
        cost_estimate=cost,
    )(x, w1, b1, w23, b23, w4, b4)

    if Bp != B:
        out = out[:B]
    return out


# ------------------------- parameters / references ---------------------------
def init_params(key, d_in, d_hidden, d_latent, dtype=jnp.float32):
    """Deterministic synthetic f32 'master' params (PyTorch-Linear-like scale).
    Weights stored [in, out]; biases [1, out]."""
    ks = jax.random.split(key, 8)

    def lin(kw, kb, fan_in, fan_out):
        bound = 1.0 / jnp.sqrt(fan_in)
        w = jax.random.uniform(kw, (fan_in, fan_out), dtype, -bound, bound)
        b = jax.random.uniform(kb, (1, fan_out), dtype, -bound, bound)
        return w, b

    w1, b1 = lin(ks[0], ks[1], d_in, d_hidden)      # encoder layer 1
    w2, b2 = lin(ks[2], ks[3], d_hidden, d_latent)  # encoder layer 2 (latent)
    w3, b3 = lin(ks[4], ks[5], d_latent, d_hidden)  # decoder layer 1
    w4, b4 = lin(ks[6], ks[7], d_hidden, d_in)      # decoder layer 2
    return dict(w1=w1, b1=b1, w2=w2, b2=b2, w3=w3, b3=b3, w4=w4, b4=b4)


def prepare_kernel_params(p):
    """Fuse the two middle linears (exact: no nonlinearity on the latent) and
    quantize weights to bf16.  Biases stay f32."""
    w23 = p["w2"] @ p["w3"]                 # [d_hidden, d_hidden], f32
    b23 = p["b2"] @ p["w3"] + p["b3"]       # [1, d_hidden], f32
    return dict(
        w1=p["w1"].astype(jnp.bfloat16), b1=p["b1"],
        w23=w23.astype(jnp.bfloat16),    b23=b23,
        w4=p["w4"].astype(jnp.bfloat16), b4=p["b4"],
    )


def reference_forward_f32(x, p):
    """Original unfused 4-layer f32 forward (semantic reference)."""
    h1 = jnp.maximum(x @ p["w1"] + p["b1"], 0.0)
    z = h1 @ p["w2"] + p["b2"]
    h2 = jnp.maximum(z @ p["w3"] + p["b3"], 0.0)
    return jax.nn.sigmoid(h2 @ p["w4"] + p["b4"])


def reference_forward_matched(x, kp):
    """Pure-JAX reference with the same bf16 quantization / fusion as the kernel."""
    xb = x.astype(jnp.bfloat16)
    h1 = jnp.maximum(
        jnp.dot(xb, kp["w1"], preferred_element_type=jnp.float32) + kp["b1"], 0.0)
    h2 = jnp.maximum(
        jnp.dot(h1.astype(jnp.bfloat16), kp["w23"],
                preferred_element_type=jnp.float32) + kp["b23"], 0.0)
    y = jnp.dot(h2.astype(jnp.bfloat16), kp["w4"],
                preferred_element_type=jnp.float32) + kp["b4"]
    return jax.nn.sigmoid(y)


# ------------------------------- test ----------------------------------------
if __name__ == "__main__":
    B, D_IN, D_HIDDEN, D_LATENT = 256, 256, 128, 32

    key = jax.random.PRNGKey(0)
    k_x, k_p = jax.random.split(key)

    x = jax.random.normal(k_x, (B, D_IN), dtype=jnp.float32)
    params = init_params(k_p, D_IN, D_HIDDEN, D_LATENT)
    kparams = prepare_kernel_params(params)

    out = autoencoder_forward(x, kparams)           # bf16 output, no padding path
    out = jax.block_until_ready(out)
    assert out.shape == (B, D_IN)
    out_f32 = out.astype(jnp.float32)

    # Check vs. a reference using identical bf16 quantization + fusion
    # (tolerance relaxed for the bf16 output rounding, ~2^-9 near 0.5).
    ref_matched = reference_forward_matched(x, kparams)
    assert jnp.allclose(out_f32, ref_matched, atol=5e-3), \
        float(jnp.max(jnp.abs(out_f32 - ref_matched)))

    # Looser semantic check vs. the original full-f32, unfused forward.
    ref_f32 = reference_forward_f32(x, params)
    assert jnp.allclose(out_f32, ref_f32, atol=3e-2), \
        float(jnp.max(jnp.abs(out_f32 - ref_f32)))

    # Exercise the ragged-batch (padding) path once as well.
    out_ragged = jax.block_until_ready(autoencoder_forward(x[:100], kparams))
    assert out_ragged.shape == (100, D_IN)
    assert jnp.allclose(out_ragged.astype(jnp.float32), ref_matched[:100], atol=5e-3)

    print("KERNEL_OK")
</pallas_src>

<mosaic_0001>
module attributes {stable_mosaic.version = 11 : i64} {
  func.func @_ae_kernel(%arg0: i32, %arg1: memref<256x256xf32, #tpu.memory_space<vmem>>, %arg2: memref<256x128xbf16, #tpu.memory_space<vmem>>, %arg3: memref<1x128xf32, #tpu.memory_space<vmem>>, %arg4: memref<128x128xbf16, #tpu.memory_space<vmem>>, %arg5: memref<1x128xf32, #tpu.memory_space<vmem>>, %arg6: memref<128x256xbf16, #tpu.memory_space<vmem>>, %arg7: memref<1x256xf32, #tpu.memory_space<vmem>>, %arg8: memref<256x256xbf16, #tpu.memory_space<vmem>>) attributes {dimension_semantics = [#tpu.dimension_semantics<parallel>], iteration_bounds = array<i64: 1>, scalar_prefetch = 0 : i64, scratch_operands = 0 : i64, tpu.core_type = #tpu.core_type<tc>, window_params = [{transform_indices = @transform_0, window_bounds = array<i64: 256, 256>}, {pipeline_mode = #tpu.pipeline_mode<synchronous>, transform_indices = @transform_1, window_bounds = array<i64: 256, 128>}, {pipeline_mode = #tpu.pipeline_mode<synchronous>, transform_indices = @transform_2, window_bounds = array<i64: 1, 128>}, {pipeline_mode = #tpu.pipeline_mode<synchronous>, transform_indices = @transform_3, window_bounds = array<i64: 128, 128>}, {pipeline_mode = #tpu.pipeline_mode<synchronous>, transform_indices = @transform_4, window_bounds = array<i64: 1, 128>}, {pipeline_mode = #tpu.pipeline_mode<synchronous>, transform_indices = @transform_5, window_bounds = array<i64: 128, 256>}, {pipeline_mode = #tpu.pipeline_mode<synchronous>, transform_indices = @transform_6, window_bounds = array<i64: 1, 256>}, {transform_indices = @transform_7, window_bounds = array<i64: 256, 256>}]} {
    %c0 = arith.constant 0 : index
    %c0_0 = arith.constant 0 : index
    %0 = vector.load %arg1[%c0, %c0_0] : memref<256x256xf32, #tpu.memory_space<vmem>>, vector<256x256xf32>
    %1 = arith.truncf %0 : vector<256x256xf32> to vector<256x256xbf16>
    %c0_1 = arith.constant 0 : index
    %c0_2 = arith.constant 0 : index
    %2 = vector.load %arg2[%c0_1, %c0_2] : memref<256x128xbf16, #tpu.memory_space<vmem>>, vector<256x128xbf16>
    %cst = arith.constant dense<0.000000e+00> : vector<256x128xf32>
    %3 = tpu.matmul %1, %2, %cst {dimension_numbers = #tpu.dot_dimension_numbers<[1], [0], [0], [1], [0, 0, 1, 1], [], []>} : vector<256x256xbf16>, vector<256x128xbf16>, vector<256x128xf32> -> vector<256x128xf32>
    %c0_3 = arith.constant 0 : index
    %c0_4 = arith.constant 0 : index
    %4 = vector.load %arg3[%c0_3, %c0_4] : memref<1x128xf32, #tpu.memory_space<vmem>>, vector<1x128xf32>
    %5 = vector.broadcast %4 : vector<1x128xf32> to vector<256x128xf32>
    %6 = arith.addf %3, %5 : vector<256x128xf32>
    %cst_5 = arith.constant 0.000000e+00 : f32
    %7 = vector.broadcast %cst_5 : f32 to vector<256x128xf32>
    %8 = arith.maximumf %6, %7 : vector<256x128xf32>
    %9 = arith.truncf %8 : vector<256x128xf32> to vector<256x128xbf16>
    %c0_6 = arith.constant 0 : index
    %c0_7 = arith.constant 0 : index
    %10 = vector.load %arg4[%c0_6, %c0_7] : memref<128x128xbf16, #tpu.memory_space<vmem>>, vector<128x128xbf16>
    %cst_8 = arith.constant dense<0.000000e+00> : vector<256x128xf32>
    %11 = tpu.matmul %9, %10, %cst_8 {dimension_numbers = #tpu.dot_dimension_numbers<[1], [0], [0], [1], [0, 0, 1, 1], [], []>} : vector<256x128xbf16>, vector<128x128xbf16>, vector<256x128xf32> -> vector<256x128xf32>
    %c0_9 = arith.constant 0 : index
    %c0_10 = arith.constant 0 : index
    %12 = vector.load %arg5[%c0_9, %c0_10] : memref<1x128xf32, #tpu.memory_space<vmem>>, vector<1x128xf32>
    %13 = vector.broadcast %12 : vector<1x128xf32> to vector<256x128xf32>
    %14 = arith.addf %11, %13 : vector<256x128xf32>
    %cst_11 = arith.constant 0.000000e+00 : f32
    %15 = vector.broadcast %cst_11 : f32 to vector<256x128xf32>
    %16 = arith.maximumf %14, %15 : vector<256x128xf32>
    %17 = arith.truncf %16 : vector<256x128xf32> to vector<256x128xbf16>
    %c0_12 = arith.constant 0 : index
    %c0_13 = arith.constant 0 : index
    %18 = vector.load %arg6[%c0_12, %c0_13] : memref<128x256xbf16, #tpu.memory_space<vmem>>, vector<128x256xbf16>
    %cst_14 = arith.constant dense<0.000000e+00> : vector<256x256xf32>
    %19 = tpu.matmul %17, %18, %cst_14 {dimension_numbers = #tpu.dot_dimension_numbers<[1], [0], [0], [1], [0, 0, 1, 1], [], []>} : vector<256x128xbf16>, vector<128x256xbf16>, vector<256x256xf32> -> vector<256x256xf32>
    %c0_15 = arith.constant 0 : index
    %c0_16 = arith.constant 0 : index
    %20 = vector.load %arg7[%c0_15, %c0_16] : memref<1x256xf32, #tpu.memory_space<vmem>>, vector<1x256xf32>
    %21 = vector.broadcast %20 : vector<1x256xf32> to vector<256x256xf32>
    %22 = arith.addf %19, %21 : vector<256x256xf32>
    %23 = arith.negf %22 : vector<256x256xf32>
    %24 = math.exp %23 : vector<256x256xf32>
    %cst_17 = arith.constant 1.000000e+00 : f32
    %25 = vector.broadcast %cst_17 : f32 to vector<256x256xf32>
    %26 = arith.addf %25, %24 : vector<256x256xf32>
    %27 = arith.divf %25, %26 : vector<256x256xf32>
    %28 = arith.truncf %27 : vector<256x256xf32> to vector<256x256xbf16>
    %c0_18 = arith.constant 0 : index
    %c0_19 = arith.constant 0 : index
    %29 = vector.load %arg8[%c0_18, %c0_19] : memref<256x256xbf16, #tpu.memory_space<vmem>>, vector<256x256xbf16>
    tpu.vector_store %arg8[%c0_18, %c0_19], %28 {strides = array<i32>} : memref<256x256xbf16, #tpu.memory_space<vmem>>, vector<256x256xbf16>,
    return
  }
  func.func @transform_0(%arg0: i32) -> (i32, i32) {
    %c0_i32 = arith.constant 0 : i32
    %c0_i32_0 = arith.constant 0 : i32
    return %arg0, %c0_i32 : i32, i32
  }
  func.func @transform_1(%arg0: i32) -> (i32, i32) {
    %c0_i32 = arith.constant 0 : i32
    %c0_i32_0 = arith.constant 0 : i32
    %c0_i32_1 = arith.constant 0 : i32
    return %c0_i32, %c0_i32_0 : i32, i32
  }
  func.func @transform_2(%arg0: i32) -> (i32, i32) {
    %c0_i32 = arith.constant 0 : i32
    %c0_i32_0 = arith.constant 0 : i32
    %c0_i32_1 = arith.constant 0 : i32
    return %c0_i32, %c0_i32_0 : i32, i32
  }
  func.func @transform_3(%arg0: i32) -> (i32, i32) {
    %c0_i32 = arith.constant 0 : i32
    %c0_i32_0 = arith.constant 0 : i32
    %c0_i32_1 = arith.constant 0 : i32
    return %c0_i32, %c0_i32_0 : i32, i32
  }
  func.func @transform_4(%arg0: i32) -> (i32, i32) {
    %c0_i32 = arith.constant 0 : i32
    %c0_i32_0 = arith.constant 0 : i32
    %c0_i32_1 = arith.constant 0 : i32
    return %c0_i32, %c0_i32_0 : i32, i32
  }
  func.func @transform_5(%arg0: i32) -> (i32, i32) {
    %c0_i32 = arith.constant 0 : i32
    %c0_i32_0 = arith.constant 0 : i32
    %c0_i32_1 = arith.constant 0 : i32
    return %c0_i32, %c0_i32_0 : i32, i32
  }
  func.func @transform_6(%arg0: i32) -> (i32, i32) {
    %c0_i32 = arith.constant 0 : i32
    %c0_i32_0 = arith.constant 0 : i32
    %c0_i32_1 = arith.constant 0 : i32
    return %c0_i32, %c0_i32_0 : i32, i32
  }
  func.func @transform_7(%arg0: i32) -> (i32, i32) {
    %c0_i32 = arith.constant 0 : i32
    %c0_i32_0 = arith.constant 0 : i32
    return %arg0, %c0_i32 : i32, i32
  }
}

</mosaic_0001>

<bundles_post_ra>
// kernel: tpu_custom_call.1
= control target key start
LH: loop header
LB: loop body
LE: loop exit
PB: predicated region body
PF: predicated region fallthrough
CT: control target
= control target key end

     0   :  { %12 = vsyncpa [#allocation3], 0  ;;  %s2765_s0 = inlined_call_operand.hbm [shape: f32[256,256], index: 0, kind: input, shape index: {}]   ;;  %s2766_s1 = inlined_call_operand.hbm [shape: bf16[256,128], index: 1, kind: input, shape index: {}]   ;;  %s2767_s2 = inlined_call_operand.vmem [shape: f32[1,128], index: 2, kind: input, shape index: {}]   ;;  %s2768_s3 = inlined_call_operand.hbm [shape: bf16[128,128], index: 3, kind: input, shape index: {}]   ;;  %s2769_s4 = inlined_call_operand.vmem [shape: f32[1,128], index: 4, kind: input, shape index: {}]   ;;  %s2770_s5 = inlined_call_operand.hbm [shape: bf16[128,256], index: 5, kind: input, shape index: {}]   ;;  %s2771_s6 = inlined_call_operand.vmem [shape: f32[1,256], index: 6, kind: input, shape index: {}]   ;;  %s2772_s7 = inlined_call_operand.hbm [shape: bf16[256,256], index: 7, kind: output, shape index: {}]  }
   0x1   :  { %13 = vsyncpa [#allocation6], 0 }
   0x2   :  { %14 = vsyncpa [#allocation9], 0 }
   0x3   :  { %15 = vsyncpa [#allocation4], 0  ;;  %s2525_s24 = smov [#allocation5]  }
   0x4   :  { %s33_s25 = sshll.u32 %s2525_s24, 4  ;;  %s34_s25 = int_to_ptr.vmem [resolvable:$true] %s33_s25 }
   0x5   :  { %s2425_s26 = scalar_lea.vmem %s34_s25, 2048  ;;  %p2430_p1 = scmp.lt.s32.totalorder %s34_s25, %s34_s25 }
   0x6   :  { %p2426_p0 = scmp.ne.s32.totalorder %s34_s25, %s2425_s26  ;;  %p2431_p2 = scmp.lt.s32.totalorder %s2425_s26, %s2425_s26 }
   0x8   :  { %p2432_p3 = por %p2431_p2, %p2430_p1 }
   0xa   :  { %p2433_p4 = pnand %p2432_p3, %p2426_p0 }
   0xc   :  { %2436 = shalt.err (!%p2433_p4)
}
   0xd   :  { %s2526_s27 = smov 64   ;;  %s2527_s28 = smov 4  }
   0xe   :  { %39 = dma.hbm_to_vmem [thread:$0]  %s2766_s1, 2048, %s34_s25, [#allocation6], %s2526_s27, %s2526_s27, %s2527_s28  }
   0xf   :  { %s2528_s8 = smov [#allocation2]  }
  0x10   :  { %s21_s9 = sshll.u32 %s2528_s8, 4  ;;  %s22_s9 = int_to_ptr.vmem [resolvable:$true] %s21_s9 }
  0x11   :  { %s2445_s10 = scalar_lea.vmem %s22_s9, 8192  ;;  %p2450_p6 = scmp.lt.s32.totalorder %s22_s9, %s22_s9 }
  0x12   :  { %p2446_p5 = scmp.ne.s32.totalorder %s22_s9, %s2445_s10  ;;  %p2451_p7 = scmp.lt.s32.totalorder %s2445_s10, %s2445_s10 }
  0x14   :  { %p2452_p8 = por %p2451_p7, %p2450_p6 }
  0x16   :  { %p2453_p9 = pnand %p2452_p8, %p2446_p5 }
  0x18   :  { %2456 = shalt.err (!%p2453_p9)
}
  0x19   :  { %s2529_s11 = smov 256   ;;  %s2530_s12 = smov 16  }
  0x1a   :  { %27 = dma.hbm_to_vmem [thread:$0]  %s2765_s0, 8192, %s22_s9, [#allocation3], %s2529_s11, %s2529_s11, %s2530_s12  }
  0x1b   :  { %s2531_s15 = smov [#allocation7]   ;;  %s2532_s17 = smov [#allocation8]  }
  0x1c   :  { %s47_s16 = sshll.u32 %s2531_s15, 4  ;;  %s61_s1 = sshll.u32 %s2532_s17, 4  ;;  %s48_s16 = int_to_ptr.vmem [resolvable:$true] %s47_s16  ;;  %s62_s1 = int_to_ptr.vmem [resolvable:$true] %s61_s1 }
  0x1d   :  { %s2465_s18 = scalar_lea.vmem %s48_s16, 1024  ;;  %p2470_p11 = scmp.lt.s32.totalorder %s48_s16, %s48_s16 }
  0x1e   :  { %p2466_p10 = scmp.ne.s32.totalorder %s48_s16, %s2465_s18  ;;  %p2471_p12 = scmp.lt.s32.totalorder %s2465_s18, %s2465_s18 }
  0x20   :  { %p2472_p13 = por %p2471_p12, %p2470_p11 }
  0x22   :  { %p2473_p0 = pnand %p2472_p13, %p2466_p10 }
  0x24   :  { %2476 = shalt.err (!%p2473_p0)
}
  0x25   :  { %53 = dma.hbm_to_vmem [thread:$0]  %s2768_s3, 1024, %s48_s16, [#allocation6], %s2526_s27, %s2526_s27, %s2527_s28  }
  0x26   :  { %s2485_s0 = scalar_lea.vmem %s62_s1, 2048  ;;  %p2490_p2 = scmp.lt.s32.totalorder %s62_s1, %s62_s1 }
  0x27   :  { %p2486_p1 = scmp.ne.s32.totalorder %s62_s1, %s2485_s0  ;;  %p2491_p3 = scmp.lt.s32.totalorder %s2485_s0, %s2485_s0 }
  0x29   :  { %p2492_p4 = por %p2491_p3, %p2490_p2 }
  0x2b   :  { %p2493_p5 = pnand %p2492_p4, %p2486_p1 }
  0x2d   :  { %2496 = shalt.err (!%p2493_p5)
}
  0x2e   :  { %s2533_s21 = smov 128   ;;  %s2534_s22 = smov 8  }
  0x2f   :  { %67 = dma.hbm_to_vmem [thread:$0]  %s2770_s5, 2048, %s62_s1, [#allocation9], %s2533_s21, %s2533_s21, %s2534_s22  }
  0x30   :  { %2517 = dma.done.wait [#allocation3], 8192  }
  0x31   :  { %2518 = vsyncadd [#allocation3], 4294959104 }
  0x32   :  { %2519 = dma.done.wait [#allocation6], 3072  }
  0x33   :  { %2520 = vsyncadd [#allocation6], 4294964224 }
  0x34   :  { %2521 = dma.done.wait [#allocation9], 2048  }
  0x35   :  { %2522 = vsyncadd [#allocation9], 4294965248  ;;  %v2113_v0 = vld [vmem:[#allocation5 + $0x78] sm:$0xff]   ;;  %v2115_v2 = vld [vmem:[#allocation5 + $0x70] sm:$0xff]  }
  0x36   :  { %v2114_v1 = vld [vmem:[#allocation5 + $0x38] sm:$0xff]   ;;  %1901 = vmatprep.subr.bf16.mxu0 %v2113_v0  ;;  %v2116_v3 = vld [vmem:[#allocation5 + $0x30] sm:$0xff]   ;;  %v2117_v4 = vld [vmem:[#allocation5 + $0x68] sm:$0xff]  }
  0x37   :  { %1902 = vmatpush3.bf16.msra.mxu0 %v2114_v1  ;;  %v2118_v5 = vld [vmem:[#allocation5 + $0x28] sm:$0xff]   ;;  %v2119_v6 = vld [vmem:[#allocation5 + $0x60] sm:$0xff]   ;;  %v2121_v8 = vld [vmem:[#allocation5 + $0x58] sm:$0xff]  }
  0x38   :  { %1903 = vmatprep.subr.bf16.mxu0 %v2115_v2  ;;  %v2120_v7 = vld [vmem:[#allocation5 + $0x20] sm:$0xff]   ;;  %v2122_v9 = vld [vmem:[#allocation5 + $0x18] sm:$0xff]   ;;  %v2123_v10 = vld [vmem:[#allocation5 + $0x50] sm:$0xff]  }
  0x39   :  { %v84_v11 = vld [vmem:[#allocation2 + $0x8] sm:$0xff]  ;;  %v86_v12 = vld [vmem:[#allocation2 + $0x18] sm:$0xff]  ;;  %v2124_v14 = vld [vmem:[#allocation5 + $0x10] sm:$0xff]  }
  0x3a   :  { %v148_v13 = vpack.c.bf16 %v86_v12, %v84_v11  ;;  %v2125_v15 = vld [vmem:[#allocation5 + $0x48] sm:$0xff]   ;;  %v2127_v17 = vld [vmem:[#allocation5 + $0x40] sm:$0xff]   ;;  %v85_v20 = vld [vmem:[#allocation2 + $0x10] sm:$0xff] }
  0x3b   :  { %1904 = vmatpush3.bf16.msra.mxu0 %v2116_v3  ;;  %v2126_v16 = vld [vmem:[#allocation5 + $0x8] sm:$0xff]   ;;  %v2128_v18 = vld [vmem:[#allocation5] sm:$0xff]   ;;  %v90_v22 = vld [vmem:[#allocation2 + $0x38] sm:$0xff] }
  0x3c   :  { %1905 = vmatprep.subr.bf16.mxu0 %v2117_v4  ;;  %346 = vmatprep.mubr.bf16.mxu0 %v148_v13  ;;  %v83_v19 = vld [vmem:[#allocation2] sm:$0xff]  ;;  %v88_v21 = vld [vmem:[#allocation2 + $0x28] sm:$0xff]  ;;  %v2129_v25 = vld [vmem:[#allocation7 + $0x38] sm:$0xff]  }
  0x3d   :  { %v147_v23 = vpack.c.bf16 %v85_v20, %v83_v19  ;;  %v150_v24 = vpack.c.bf16 %v90_v22, %v88_v21  ;;  %2085 = vmatprep.subr.bf16.mxu1 %v2129_v25  ;;  %v87_v26 = vld [vmem:[#allocation2 + $0x20] sm:$0xff]  ;;  %v89_v27 = vld [vmem:[#allocation2 + $0x30] sm:$0xff]  ;;  %v92_v29 = vld [vmem:[#allocation2 + $0x48] sm:$0xff] }
  0x3e   :  { %2093 = vmatpush3.bf16.msra.mxu1 %v2129_v25  ;;  %v2130_v28 = vld [vmem:[#allocation7 + $0x30] sm:$0xff]   ;;  %v94_v30 = vld [vmem:[#allocation2 + $0x58] sm:$0xff]  ;;  %v149_v31 = vpack.c.bf16 %v89_v27, %v87_v26  ;;  %v2131_v32 = vld [vmem:[#allocation7 + $0x28] sm:$0xff]  }
  0x3f   :  { %1906 = vmatpush3.bf16.msra.mxu0 %v2118_v5  ;;  %2086 = vmatprep.subr.bf16.mxu1 %v2130_v28  ;;  %v152_v33 = vpack.c.bf16 %v94_v30, %v92_v29  ;;  %v91_v34 = vld [vmem:[#allocation2 + $0x40] sm:$0xff]  ;;  %v93_v35 = vld [vmem:[#allocation2 + $0x50] sm:$0xff]  ;;  %v96_v37 = vld [vmem:[#allocation2 + $0x68] sm:$0xff] }
  0x40   :  { %1907 = vmatprep.subr.bf16.mxu0 %v2119_v6  ;;  %v2132_v36 = vld [vmem:[#allocation7 + $0x20] sm:$0xff]   ;;  %v98_v38 = vld [vmem:[#allocation2 + $0x78] sm:$0xff]  ;;  %v151_v40 = vpack.c.bf16 %v93_v35, %v91_v34  ;;  %v2134_v41 = vld [vmem:[#allocation7 + $0x10] sm:$0xff]  }
  0x41   :  { %v2133_v39 = vld [vmem:[#allocation7 + $0x18] sm:$0xff]   ;;  %v154_v42 = vpack.c.bf16 %v98_v38, %v96_v37  ;;  %v95_v43 = vld [vmem:[#allocation2 + $0x60] sm:$0xff]  ;;  %v97_v44 = vld [vmem:[#allocation2 + $0x70] sm:$0xff] }
  0x42   :  { %2094 = vmatpush3.bf16.msra.mxu1 %v2130_v28  ;;  %v100_v45 = vld [vmem:[#allocation2 + $0x88] sm:$0xff]  ;;  %v102_v46 = vld [vmem:[#allocation2 + $0x98] sm:$0xff]  ;;  %v153_v48 = vpack.c.bf16 %v97_v44, %v95_v43  ;;  %v99_v50 = vld [vmem:[#allocation2 + $0x80] sm:$0xff] }
  0x43   :  { %1908 = vmatpush3.bf16.msra.mxu0 %v2120_v7  ;;  %2087 = vmatprep.subr.bf16.mxu1 %v2131_v32  ;;  %v2135_v47 = vld [vmem:[#allocation7 + $0x8] sm:$0xff]   ;;  %v156_v49 = vpack.c.bf16 %v102_v46, %v100_v45  ;;  %v101_v51 = vld [vmem:[#allocation2 + $0x90] sm:$0xff]  ;;  %v106_v53 = vld [vmem:[#allocation2 + $0xb8] sm:$0xff] }
  0x44   :  { %1909 = vmatprep.subr.bf16.mxu0 %v2121_v8  ;;  %v104_v52 = vld [vmem:[#allocation2 + $0xa8] sm:$0xff]  ;;  %v155_v54 = vpack.c.bf16 %v101_v51, %v99_v50  ;;  %v103_v56 = vld [vmem:[#allocation2 + $0xa0] sm:$0xff]  ;;  %v105_v57 = vld [vmem:[#allocation2 + $0xb0] sm:$0xff] }
  0x45   :  { %v158_v55 = vpack.c.bf16 %v106_v53, %v104_v52  ;;  %v108_v58 = vld [vmem:[#allocation2 + $0xc8] sm:$0xff]  ;;  %v110_v59 = vld [vmem:[#allocation2 + $0xd8] sm:$0xff]  ;;  %v157_v60 = vpack.c.bf16 %v105_v57, %v103_v56  ;;  %v107_v62 = vld [vmem:[#allocation2 + $0xc0] sm:$0xff] }
  0x46   :  { %2095 = vmatpush3.bf16.msra.mxu1 %v2131_v32  ;;  %v160_v61 = vpack.c.bf16 %v110_v59, %v108_v58  ;;  %v109_v63 = vld [vmem:[#allocation2 + $0xd0] sm:$0xff]  ;;  %v112_v0 = vld [vmem:[#allocation2 + $0xe8] sm:$0xff]  ;;  %v114_v1 = vld [vmem:[#allocation2 + $0xf8] sm:$0xff] }
  0x47   :  { %1910 = vmatpush3.bf16.msra.mxu0 %v2122_v9  ;;  %2088 = vmatprep.subr.bf16.mxu1 %v2132_v36  ;;  %v159_v2 = vpack.c.bf16 %v109_v63, %v107_v62  ;;  %v162_v3 = vpack.c.bf16 %v114_v1, %v112_v0  ;;  %v111_v4 = vld [vmem:[#allocation2 + $0xe0] sm:$0xff]  ;;  %v113_v5 = vld [vmem:[#allocation2 + $0xf0] sm:$0xff]  ;;  %v116_v6 = vld [vmem:[#allocation2 + $0x108] sm:$0xff] }
  0x48   :  { %1911 = vmatprep.subr.bf16.mxu0 %v2123_v10  ;;  %v118_v7 = vld [vmem:[#allocation2 + $0x118] sm:$0xff]  ;;  %v161_v8 = vpack.c.bf16 %v113_v5, %v111_v4  ;;  %v115_v10 = vld [vmem:[#allocation2 + $0x100] sm:$0xff]  ;;  %v117_v11 = vld [vmem:[#allocation2 + $0x110] sm:$0xff] }
  0x49   :  { %v164_v9 = vpack.c.bf16 %v118_v7, %v116_v6  ;;  %v120_v12 = vld [vmem:[#allocation2 + $0x128] sm:$0xff]  ;;  %v122_v13 = vld [vmem:[#allocation2 + $0x138] sm:$0xff]  ;;  %v123_v22 = vld [vmem:[#allocation2 + $0x140] sm:$0xff] }
  0x4a   :  { %2096 = vmatpush3.bf16.msra.mxu1 %v2132_v36  ;;  %v126_v19 = vld [vmem:[#allocation2 + $0x158] sm:$0xff]  ;;  %v2136_v26 = vld [vmem:[#allocation7] sm:$0xff]   ;;  %v129_v30 = vld [vmem:[#allocation2 + $0x170] sm:$0xff] }
  0x4b   :  { %1912 = vmatpush3.bf16.msra.mxu0 %v2124_v14  ;;  %2089 = vmatprep.subr.bf16.mxu1 %v2133_v39  ;;  %v163_v14 = vpack.c.bf16 %v117_v11, %v115_v10  ;;  %v127_v29 = vld [vmem:[#allocation2 + $0x160] sm:$0xff]  ;;  %v136_v37 = vld [vmem:[#allocation2 + $0x1a8] sm:$0xff]  ;;  %v138_v38 = vld [vmem:[#allocation2 + $0x1b8] sm:$0xff] }
  0x4c   :  { %1913 = vmatprep.subr.bf16.mxu0 %v2125_v15  ;;  %v166_v15 = vpack.c.bf16 %v122_v13, %v120_v12  ;;  %v131_v35 = vld [vmem:[#allocation2 + $0x180] sm:$0xff]  ;;  %v140_v43 = vld [vmem:[#allocation2 + $0x1c8] sm:$0xff]  ;;  %v142_v44 = vld [vmem:[#allocation2 + $0x1d8] sm:$0xff] }
  0x4d   :  { %v176_v46 = vpack.c.bf16 %v142_v44, %v140_v43  ;;  %v146_v50 = vld [vmem:[#allocation2 + $0x1f8] sm:$0xff]  ;;  %v143_v53 = vld [vmem:[#allocation2 + $0x1e0] sm:$0xff] }
  0x4e   :  { %2097 = vmatpush3.bf16.msra.mxu1 %v2133_v39  ;;  %v2601_v59 = vld [vmem:[%s2767_s2] ss:$0 sm:$0xff]  ;;  %v2139_v0 = vld [vmem:[#allocation8 + $0x74] ss:$8 sps:$4 sm:$0xff]  }
  0x4f   :  { %1914 = vmatpush3.bf16.msra.mxu0 %v2126_v16  ;;  %2090 = vmatprep.subr.bf16.mxu1 %v2134_v41  ;;  %v119_v16 = vld [vmem:[#allocation2 + $0x120] sm:$0xff] }
  0x50   :  { %1915 = vmatprep.subr.bf16.mxu0 %v2127_v17  ;;  %v121_v17 = vld [vmem:[#allocation2 + $0x130] sm:$0xff] }
  0x51   :  { %v165_v20 = vpack.c.bf16 %v121_v17, %v119_v16 }
  0x52   :  { %2098 = vmatpush3.bf16.msra.mxu1 %v2134_v41 }
  0x53   :  { %1916 = vmatpush3.bf16.msra.mxu0 %v2128_v18  ;;  %2091 = vmatprep.subr.bf16.mxu1 %v2135_v47  ;;  %v124_v18 = vld [vmem:[#allocation2 + $0x148] sm:$0xff] }
  0x54   :  { %2037 = vmatprep.subr.bf16.mxu0 %v2129_v25  ;;  %v168_v21 = vpack.c.bf16 %v126_v19, %v124_v18 }
  0x56   :  { %347 = vmatmul.mubr.bf16.vlgmr.msra.gmra.mxu0 %v147_v23  ;;  %2099 = vmatpush3.bf16.msra.mxu1 %v2135_v47  ;;  %v125_v23 = vld [vmem:[#allocation2 + $0x150] sm:$0xff] }
  0x57   :  { %354 = vmatprep.mubr.bf16.mxu0 %v150_v24  ;;  %2038 = vmatpush3.bf16.msra.mxu0 %v2129_v25  ;;  %v128_v24 = vld [vmem:[#allocation2 + $0x168] sm:$0xff]  ;;  %v130_v25 = vld [vmem:[#allocation2 + $0x178] sm:$0xff]  ;;  %v167_v27 = vpack.c.bf16 %v125_v23, %v123_v22 }
  0x58   :  { %2039 = vmatprep.subr.bf16.mxu0 %v2130_v28  ;;  %2092 = vmatprep.subr.bf16.mxu1 %v2136_v26 }
  0x5a   :  { %2100 = vmatpush3.bf16.msra.mxu1 %v2136_v26 }
  0x5b   :  { %2040 = vmatpush3.bf16.msra.mxu0 %v2130_v28  ;;  %v170_v28 = vpack.c.bf16 %v130_v25, %v128_v24  ;;  %911 = vmatprep.subr.bf16.mxu1 %v2139_v0 }
  0x5c   :  { %2041 = vmatprep.subr.bf16.mxu0 %v2131_v32 }
  0x5e   :  { %355 = vmatmul.mubr.bf16.gmra.mxu0 %v149_v31  ;;  %v132_v31 = vld [vmem:[#allocation2 + $0x188] sm:$0xff] }
  0x5f   :  { %362 = vmatprep.mubr.bf16.mxu0 %v152_v33  ;;  %2042 = vmatpush3.bf16.msra.mxu0 %v2131_v32  ;;  %v134_v32 = vld [vmem:[#allocation2 + $0x198] sm:$0xff]  ;;  %v169_v33 = vpack.c.bf16 %v129_v30, %v127_v29 }
  0x60   :  { %2043 = vmatprep.subr.bf16.mxu0 %v2132_v36  ;;  %v172_v34 = vpack.c.bf16 %v134_v32, %v132_v31 }
  0x63   :  { %2044 = vmatpush3.bf16.msra.mxu0 %v2132_v36  ;;  %v133_v36 = vld [vmem:[#allocation2 + $0x190] sm:$0xff] }
  0x64   :  { %2045 = vmatprep.subr.bf16.mxu0 %v2133_v39 }
  0x66   :  { %363 = vmatmul.mubr.bf16.gmra.mxu0 %v151_v40  ;;  %v174_v40 = vpack.c.bf16 %v138_v38, %v136_v37 }
  0x67   :  { %370 = vmatprep.mubr.bf16.mxu0 %v154_v42  ;;  %2046 = vmatpush3.bf16.msra.mxu0 %v2133_v39  ;;  %v171_v39 = vpack.c.bf16 %v133_v36, %v131_v35  ;;  %v137_v42 = vld [vmem:[#allocation2 + $0x1b0] sm:$0xff] }
  0x68   :  { %2047 = vmatprep.subr.bf16.mxu0 %v2134_v41 }
  0x6b   :  { %2048 = vmatpush3.bf16.msra.mxu0 %v2134_v41  ;;  %v135_v41 = vld [vmem:[#allocation2 + $0x1a0] sm:$0xff] }
  0x6c   :  { %2049 = vmatprep.subr.bf16.mxu0 %v2135_v47  ;;  %v173_v45 = vpack.c.bf16 %v137_v42, %v135_v41 }
  0x6e   :  { %371 = vmatmul.mubr.bf16.gmra.mxu0 %v153_v48  ;;  %v141_v48 = vld [vmem:[#allocation2 + $0x1d0] sm:$0xff] }
  0x6f   :  { %378 = vmatprep.mubr.bf16.mxu0 %v156_v49  ;;  %2050 = vmatpush3.bf16.msra.mxu0 %v2135_v47  ;;  %v139_v47 = vld [vmem:[#allocation2 + $0x1c0] sm:$0xff]  ;;  %v144_v49 = vld [vmem:[#allocation2 + $0x1e8] sm:$0xff] }
  0x70   :  { %2051 = vmatprep.subr.bf16.mxu0 %v2136_v26  ;;  %v175_v51 = vpack.c.bf16 %v141_v48, %v139_v47  ;;  %v178_v52 = vpack.c.bf16 %v146_v50, %v144_v49 }
  0x73   :  { %2052 = vmatpush3.bf16.msra.mxu0 %v2136_v26 }
  0x76   :  { %379 = vmatmul.mubr.bf16.gmra.mxu0 %v155_v54  ;;  %v145_v54 = vld [vmem:[#allocation2 + $0x1f0] sm:$0xff] }
  0x77   :  { %386 = vmatprep.mubr.bf16.mxu0 %v158_v55  ;;  %v177_v55 = vpack.c.bf16 %v145_v54, %v143_v53 }
  0x7e   :  { %387 = vmatmul.mubr.bf16.gmra.mxu0 %v157_v60 }
  0x7f   :  { %394 = vmatprep.mubr.bf16.mxu0 %v160_v61 }
  0x86   :  { %395 = vmatmul.mubr.bf16.gmra.mxu0 %v159_v2 }
  0x87   :  { %402 = vmatprep.mubr.bf16.mxu0 %v162_v3 }
  0x8e   :  { %403 = vmatmul.mubr.bf16.gmra.mxu0 %v161_v8 }
  0x8f   :  { %410 = vmatprep.mubr.bf16.mxu0 %v164_v9 }
  0x96   :  { %411 = vmatmul.mubr.bf16.gmra.mxu0 %v163_v14 }
  0x97   :  { %418 = vmatprep.mubr.bf16.mxu0 %v166_v15 }
  0x9e   :  { %419 = vmatmul.mubr.bf16.gmra.mxu0 %v165_v20 }
  0x9f   :  { %426 = vmatprep.mubr.bf16.mxu0 %v168_v21 }
  0xa6   :  { %427 = vmatmul.mubr.bf16.gmra.mxu0 %v167_v27 }
  0xa7   :  { %434 = vmatprep.mubr.bf16.mxu0 %v170_v28 }
  0xae   :  { %435 = vmatmul.mubr.bf16.gmra.mxu0 %v169_v33 }
  0xaf   :  { %442 = vmatprep.mubr.bf16.mxu0 %v172_v34 }
  0xb6   :  { %443 = vmatmul.mubr.bf16.gmra.mxu0 %v171_v39 }
  0xb7   :  { %450 = vmatprep.mubr.bf16.mxu0 %v174_v40 }
  0xbe   :  { %451 = vmatmul.mubr.bf16.gmra.mxu0 %v173_v45 }
  0xbf   :  { %458 = vmatprep.mubr.bf16.mxu0 %v176_v46 }
  0xc6   :  { %459 = vmatmul.mubr.bf16.gmra.mxu0 %v175_v51 }
  0xc7   :  { %466 = vmatprep.mubr.bf16.mxu0 %v178_v52 }
  0xce   :  { %467 = vmatmul.mubr.bf16.gmra.mxu0 %v177_v55 }
 0x116   :  { %v1917_v56 = vpop.f32.mrf.mxu0 }
 0x118   :  { %v1918_v57 = vpop.f32.mrf.mxu0 }
 0x119   :  { %v1919_v58 = vadd.f32 %v1918_v57, %v1917_v56 }
 0x11a   :  { %v1920_v60 = vpop.f32.mrf.mxu0 }
 0x11b   :  { %v349_v62 = vadd.f32 %v1919_v58, %v2601_v59 }
 0x11c   :  { %v1921_v61 = vpop.f32.mrf.mxu0 }
 0x11d   :  { %v1922_v63 = vadd.f32 %v1921_v61, %v1920_v60  ;;  %v475_v4 = vmax.f32 %v349_v62, 0.0 }
 0x11e   :  { %v1923_v1 = vpop.f32.mrf.mxu0 }
 0x11f   :  { %v352_v2 = vadd.f32 %v1922_v63, %v2601_v59 }
 0x120   :  { %v1924_v3 = vpop.f32.mrf.mxu0 }
 0x121   :  { %v476_v5 = vmax.f32 %v352_v2, 0.0  ;;  %v1925_v6 = vadd.f32 %v1924_v3, %v1923_v1 }
 0x122   :  { %v1926_v7 = vpop.f32.mrf.mxu0 }
 0x123   :  { %v507_v8 = vpack.c.bf16 %v476_v5, %v475_v4  ;;  %v357_v10 = vadd.f32 %v1925_v6, %v2601_v59 }
 0x124   :  { %v1927_v9 = vpop.f32.mrf.mxu0 }
 0x125   :  { %v1928_v11 = vadd.f32 %v1927_v9, %v1926_v7  ;;  %2053 = vmatprep.mubr.bf16.mxu0 %v507_v8  ;;  %v477_v15 = vmax.f32 %v357_v10, 0.0 }
 0x126   :  { %v1929_v12 = vpop.f32.mrf.mxu0 }
 0x127   :  { %v360_v13 = vadd.f32 %v1928_v11, %v2601_v59 }
 0x128   :  { %v1930_v14 = vpop.f32.mrf.mxu0 }
 0x129   :  { %v478_v16 = vmax.f32 %v360_v13, 0.0  ;;  %v1931_v17 = vadd.f32 %v1930_v14, %v1929_v12 }
 0x12a   :  { %v1932_v18 = vpop.f32.mrf.mxu0 }
 0x12b   :  { %v508_v19 = vpack.c.bf16 %v478_v16, %v477_v15  ;;  %v365_v21 = vadd.f32 %v1931_v17, %v2601_v59 }
 0x12c   :  { %v1933_v20 = vpop.f32.mrf.mxu0 }
 0x12d   :  { %v1934_v22 = vadd.f32 %v1933_v20, %v1932_v18  ;;  %2054 = vmatmul.mubr.bf16.vlgmr.msra.gmra.mxu0 %v508_v19  ;;  %v479_v26 = vmax.f32 %v365_v21, 0.0 }
 0x12e   :  { %v1935_v23 = vpop.f32.mrf.mxu0 }
 0x12f   :  { %v368_v24 = vadd.f32 %v1934_v22, %v2601_v59 }
 0x130   :  { %v1936_v25 = vpop.f32.mrf.mxu0 }
 0x131   :  { %v480_v27 = vmax.f32 %v368_v24, 0.0  ;;  %v1937_v28 = vadd.f32 %v1936_v25, %v1935_v23 }
 0x132   :  { %v1938_v29 = vpop.f32.mrf.mxu0 }
 0x133   :  { %v509_v30 = vpack.c.bf16 %v480_v27, %v479_v26  ;;  %v373_v32 = vadd.f32 %v1937_v28, %v2601_v59 }
 0x134   :  { %v1939_v31 = vpop.f32.mrf.mxu0 }
 0x135   :  { %v1940_v33 = vadd.f32 %v1939_v31, %v1938_v29  ;;  %2057 = vmatprep.mubr.bf16.mxu0 %v509_v30  ;;  %v481_v37 = vmax.f32 %v373_v32, 0.0 }
 0x136   :  { %v1941_v34 = vpop.f32.mrf.mxu0 }
 0x137   :  { %v376_v35 = vadd.f32 %v1940_v33, %v2601_v59 }
 0x138   :  { %v1942_v36 = vpop.f32.mrf.mxu0 }
 0x139   :  { %v482_v38 = vmax.f32 %v376_v35, 0.0  ;;  %v1943_v39 = vadd.f32 %v1942_v36, %v1941_v34 }
 0x13a   :  { %v1944_v40 = vpop.f32.mrf.mxu0 }
 0x13b   :  { %v510_v41 = vpack.c.bf16 %v482_v38, %v481_v37  ;;  %v381_v43 = vadd.f32 %v1943_v39, %v2601_v59 }
 0x13c   :  { %v1945_v42 = vpop.f32.mrf.mxu0 }
 0x13d   :  { %v1946_v44 = vadd.f32 %v1945_v42, %v1944_v40  ;;  %2058 = vmatmul.mubr.bf16.gmra.mxu0 %v510_v41  ;;  %v483_v48 = vmax.f32 %v381_v43, 0.0 }
 0x13e   :  { %v1947_v45 = vpop.f32.mrf.mxu0 }
 0x13f   :  { %v384_v46 = vadd.f32 %v1946_v44, %v2601_v59  ;;  %v2137_v44 = vld [vmem:[#allocation8 + $0x70] ss:$8 sps:$4 sm:$0xff]  }
 0x140   :  { %v1948_v47 = vpop.f32.mrf.mxu0 }
 0x141   :  { %v484_v49 = vmax.f32 %v384_v46, 0.0  ;;  %v1949_v50 = vadd.f32 %v1948_v47, %v1947_v45  ;;  %v2142_v46 = vld [vmem:[#allocation8 + $0x64] ss:$8 sps:$4 sm:$0xff]  }
 0x142   :  { %v1950_v51 = vpop.f32.mrf.mxu0 }
 0x143   :  { %v511_v52 = vpack.c.bf16 %v484_v49, %v483_v48  ;;  %v389_v54 = vadd.f32 %v1949_v50, %v2601_v59 }
 0x144   :  { %v1951_v53 = vpop.f32.mrf.mxu0 }
 0x145   :  { %v1952_v55 = vadd.f32 %v1951_v53, %v1950_v51  ;;  %2061 = vmatprep.mubr.bf16.mxu0 %v511_v52  ;;  %v485_v60 = vmax.f32 %v389_v54, 0.0  ;;  %v2140_v51 = vld [vmem:[#allocation8 + $0x60] ss:$8 sps:$4 sm:$0xff]   ;;  %v2145_v53 = vld [vmem:[#allocation8 + $0x54] ss:$8 sps:$4 sm:$0xff]  }
 0x146   :  { %v1953_v56 = vpop.f32.mrf.mxu0 }
 0x147   :  { %v392_v57 = vadd.f32 %v1952_v55, %v2601_v59 }
 0x148   :  { %v1954_v58 = vpop.f32.mrf.mxu0 }
 0x149   :  { %v486_v61 = vmax.f32 %v392_v57, 0.0  ;;  %v1955_v62 = vadd.f32 %v1954_v58, %v1953_v56 }
 0x14a   :  { %v1956_v63 = vpop.f32.mrf.mxu0 }
 0x14b   :  { %v512_v0 = vpack.c.bf16 %v486_v61, %v485_v60  ;;  %v397_v2 = vadd.f32 %v1955_v62, %v2601_v59  ;;  %v2143_v60 = vld [vmem:[#allocation8 + $0x50] ss:$8 sps:$4 sm:$0xff]   ;;  %v2148_v62 = vld [vmem:[#allocation8 + $0x44] ss:$8 sps:$4 sm:$0xff]  }
 0x14c   :  { %v1957_v1 = vpop.f32.mrf.mxu0 }
 0x14d   :  { %v1958_v3 = vadd.f32 %v1957_v1, %v1956_v63  ;;  %2062 = vmatmul.mubr.bf16.gmra.mxu0 %v512_v0  ;;  %v487_v7 = vmax.f32 %v397_v2, 0.0 }
 0x14e   :  { %v1959_v4 = vpop.f32.mrf.mxu0 }
 0x14f   :  { %v400_v5 = vadd.f32 %v1958_v3, %v2601_v59  ;;  %v2146_v3 = vld [vmem:[#allocation8 + $0x40] ss:$8 sps:$4 sm:$0xff]  }
 0x150   :  { %v1960_v6 = vpop.f32.mrf.mxu0 }
 0x151   :  { %v488_v8 = vmax.f32 %v400_v5, 0.0  ;;  %v1961_v9 = vadd.f32 %v1960_v6, %v1959_v4  ;;  %v2151_v5 = vld [vmem:[#allocation8 + $0x34] ss:$8 sps:$4 sm:$0xff]  }
 0x152   :  { %v1962_v10 = vpop.f32.mrf.mxu0 }
 0x153   :  { %v513_v11 = vpack.c.bf16 %v488_v8, %v487_v7  ;;  %v405_v13 = vadd.f32 %v1961_v9, %v2601_v59 }
 0x154   :  { %v1963_v12 = vpop.f32.mrf.mxu0 }
 0x155   :  { %v1964_v14 = vadd.f32 %v1963_v12, %v1962_v10  ;;  %2065 = vmatprep.mubr.bf16.mxu0 %v513_v11  ;;  %v489_v18 = vmax.f32 %v405_v13, 0.0  ;;  %v2149_v11 = vld [vmem:[#allocation8 + $0x30] ss:$8 sps:$4 sm:$0xff]   ;;  %v2154_v13 = vld [vmem:[#allocation8 + $0x24] ss:$8 sps:$4 sm:$0xff]  }
 0x156   :  { %v1965_v15 = vpop.f32.mrf.mxu0 }
 0x157   :  { %v408_v16 = vadd.f32 %v1964_v14, %v2601_v59 }
 0x158   :  { %v1966_v17 = vpop.f32.mrf.mxu0 }
 0x159   :  { %v490_v19 = vmax.f32 %v408_v16, 0.0  ;;  %v1967_v20 = vadd.f32 %v1966_v17, %v1965_v15 }
 0x15a   :  { %v1968_v21 = vpop.f32.mrf.mxu0 }
 0x15b   :  { %v514_v22 = vpack.c.bf16 %v490_v19, %v489_v18  ;;  %v413_v25 = vadd.f32 %v1967_v20, %v2601_v59  ;;  %v2152_v18 = vld [vmem:[#allocation8 + $0x20] ss:$8 sps:$4 sm:$0xff]   ;;  %v2157_v20 = vld [vmem:[#allocation8 + $0x14] ss:$8 sps:$4 sm:$0xff]  }
 0x15c   :  { %v1969_v23 = vpop.f32.mrf.mxu0 }
 0x15d   :  { %v1970_v24 = vadd.f32 %v1969_v23, %v1968_v21  ;;  %2066 = vmatmul.mubr.bf16.gmra.mxu0 %v514_v22  ;;  %v491_v30 = vmax.f32 %v413_v25, 0.0 }
 0x15e   :  { %v1971_v26 = vpop.f32.mrf.mxu0 }
 0x15f   :  { %v416_v27 = vadd.f32 %v1970_v24, %v2601_v59 }
 0x160   :  { %v1972_v28 = vpop.f32.mrf.mxu0 }
 0x161   :  { %v1973_v29 = vadd.f32 %v1972_v28, %v1971_v26  ;;  %v492_v31 = vmax.f32 %v416_v27, 0.0  ;;  %v2155_v26 = vld [vmem:[#allocation8 + $0x10] ss:$8 sps:$4 sm:$0xff]   ;;  %v2160_v28 = vld [vmem:[#allocation8 + $0x4] ss:$8 sps:$4 sm:$0xff]  }
 0x162   :  { %v1974_v32 = vpop.f32.mrf.mxu0 }
 0x163   :  { %v515_v33 = vpack.c.bf16 %v492_v31, %v491_v30  ;;  %v421_v35 = vadd.f32 %v1973_v29, %v2601_v59 }
 0x164   :  { %v1975_v34 = vpop.f32.mrf.mxu0 }
 0x165   :  { %v1976_v36 = vadd.f32 %v1975_v34, %v1974_v32  ;;  %2069 = vmatprep.mubr.bf16.mxu1 %v515_v33  ;;  %v493_v40 = vmax.f32 %v421_v35, 0.0  ;;  %v2158_v33 = vld [vmem:[#allocation8] ss:$8 sps:$4 sm:$0xff]  }
 0x166   :  { %v1977_v37 = vpop.f32.mrf.mxu0 }
 0x167   :  { %v424_v38 = vadd.f32 %v1976_v36, %v2601_v59 }
 0x168   :  { %v1978_v39 = vpop.f32.mrf.mxu0 }
 0x169   :  { %v494_v41 = vmax.f32 %v424_v38, 0.0  ;;  %v1979_v42 = vadd.f32 %v1978_v39, %v1977_v37 }
 0x16a   :  { %v1980_v43 = vpop.f32.mrf.mxu0 }
 0x16b   :  { %v516_v45 = vpack.c.bf16 %v494_v41, %v493_v40  ;;  %v429_v48 = vadd.f32 %v1979_v42, %v2601_v59 }
 0x16c   :  { %v1981_v47 = vpop.f32.mrf.mxu0 }
 0x16d   :  { %v1982_v49 = vadd.f32 %v1981_v47, %v1980_v43  ;;  %2070 = vmatmul.mubr.bf16.vlgmr.msra.gmra.mxu1 %v516_v45  ;;  %v495_v55 = vmax.f32 %v429_v48, 0.0 }
 0x16e   :  { %v1983_v50 = vpop.f32.mrf.mxu0  ;;  %912 = vmatpush1.bf16.msra.mxu1 %v2137_v44 }
 0x16f   :  { %v432_v52 = vadd.f32 %v1982_v49, %v2601_v59  ;;  %913 = vmatprep.subr.bf16.mxu1 %v2142_v46 }
 0x170   :  { %v1984_v54 = vpop.f32.mrf.mxu0 }
 0x171   :  { %v496_v56 = vmax.f32 %v432_v52, 0.0  ;;  %v1985_v57 = vadd.f32 %v1984_v54, %v1983_v50 }
 0x172   :  { %v1986_v58 = vpop.f32.mrf.mxu0  ;;  %914 = vmatpush1.bf16.msra.mxu1 %v2140_v51 }
 0x173   :  { %v517_v61 = vpack.c.bf16 %v496_v56, %v495_v55  ;;  %915 = vmatprep.subr.bf16.mxu1 %v2145_v53  ;;  %v437_v0 = vadd.f32 %v1985_v57, %v2601_v59 }
 0x174   :  { %v1987_v63 = vpop.f32.mrf.mxu0 }
 0x175   :  { %v1988_v1 = vadd.f32 %v1987_v63, %v1986_v58  ;;  %2073 = vmatprep.mubr.bf16.mxu1 %v517_v61  ;;  %v497_v7 = vmax.f32 %v437_v0, 0.0  ;;  %v2639_v63 = vld [vmem:[%s2769_s4] ss:$0 sm:$0xff] }
 0x176   :  { %v1989_v2 = vpop.f32.mrf.mxu0  ;;  %916 = vmatpush1.bf16.msra.mxu1 %v2143_v60  ;;  %v2535_v60 = vmov 0  }
 0x177   :  { %v440_v4 = vadd.f32 %v1988_v1, %v2601_v59  ;;  %917 = vmatprep.subr.bf16.mxu1 %v2148_v62 }
 0x178   :  { %v1990_v6 = vpop.f32.mrf.mxu0 }
 0x179   :  { %v498_v8 = vmax.f32 %v440_v4, 0.0  ;;  %v1991_v9 = vadd.f32 %v1990_v6, %v1989_v2 }
 0x17a   :  { %v1992_v10 = vpop.f32.mrf.mxu0  ;;  %918 = vmatpush1.bf16.msra.mxu1 %v2146_v3 }
 0x17b   :  { %v518_v12 = vpack.c.bf16 %v498_v8, %v497_v7  ;;  %919 = vmatprep.subr.bf16.mxu1 %v2151_v5  ;;  %v445_v15 = vadd.f32 %v1991_v9, %v2601_v59 }
 0x17c   :  { %v1993_v14 = vpop.f32.mrf.mxu0 }
 0x17d   :  { %v1994_v16 = vadd.f32 %v1993_v14, %v1992_v10  ;;  %2074 = vmatmul.mubr.bf16.gmra.mxu1 %v518_v12  ;;  %v499_v22 = vmax.f32 %v445_v15, 0.0 }
 0x17e   :  { %v1995_v17 = vpop.f32.mrf.mxu0  ;;  %920 = vmatpush1.bf16.msra.mxu1 %v2149_v11 }
 0x17f   :  { %v448_v19 = vadd.f32 %v1994_v16, %v2601_v59  ;;  %921 = vmatprep.subr.bf16.mxu1 %v2154_v13 }
 0x180   :  { %v1996_v21 = vpop.f32.mrf.mxu0 }
 0x181   :  { %v500_v23 = vmax.f32 %v448_v19, 0.0  ;;  %v1997_v24 = vadd.f32 %v1996_v21, %v1995_v17 }
 0x182   :  { %v1998_v25 = vpop.f32.mrf.mxu0  ;;  %922 = vmatpush1.bf16.msra.mxu1 %v2152_v18 }
 0x183   :  { %v519_v27 = vpack.c.bf16 %v500_v23, %v499_v22  ;;  %923 = vmatprep.subr.bf16.mxu1 %v2157_v20  ;;  %v453_v30 = vadd.f32 %v1997_v24, %v2601_v59 }
 0x184   :  { %v1999_v29 = vpop.f32.mrf.mxu0 }
 0x185   :  { %v2000_v31 = vadd.f32 %v1999_v29, %v1998_v25  ;;  %2077 = vmatprep.mubr.bf16.mxu1 %v519_v27  ;;  %v501_v36 = vmax.f32 %v453_v30, 0.0 }
 0x186   :  { %v2001_v32 = vpop.f32.mrf.mxu0  ;;  %924 = vmatpush1.bf16.msra.mxu1 %v2155_v26 }
 0x187   :  { %v456_v34 = vadd.f32 %v2000_v31, %v2601_v59  ;;  %925 = vmatprep.subr.bf16.mxu1 %v2160_v28 }
 0x188   :  { %v2002_v35 = vpop.f32.mrf.mxu0 }
 0x189   :  { %v502_v37 = vmax.f32 %v456_v34, 0.0  ;;  %v2003_v38 = vadd.f32 %v2002_v35, %v2001_v32 }
 0x18a   :  { %v2004_v39 = vpop.f32.mrf.mxu0  ;;  %926 = vmatpush1.bf16.msra.mxu1 %v2158_v33 }
 0x18b   :  { %v520_v40 = vpack.c.bf16 %v502_v37, %v501_v36  ;;  %v461_v42 = vadd.f32 %v2003_v38, %v2601_v59 }
 0x18c   :  { %v2005_v41 = vpop.f32.mrf.mxu0 }
 0x18d   :  { %v2006_v43 = vadd.f32 %v2005_v41, %v2004_v39  ;;  %2078 = vmatmul.mubr.bf16.gmra.mxu1 %v520_v40  ;;  %v503_v47 = vmax.f32 %v461_v42, 0.0 }
 0x18e   :  { %v2007_v44 = vpop.f32.mrf.mxu0 }
 0x18f   :  { %v464_v45 = vadd.f32 %v2006_v43, %v2601_v59 }
 0x190   :  { %v2008_v46 = vpop.f32.mrf.mxu0 }
 0x191   :  { %v504_v48 = vmax.f32 %v464_v45, 0.0  ;;  %v2009_v49 = vadd.f32 %v2008_v46, %v2007_v44 }
 0x192   :  { %v2010_v50 = vpop.f32.mrf.mxu0 }
 0x193   :  { %v521_v51 = vpack.c.bf16 %v504_v48, %v503_v47  ;;  %v469_v53 = vadd.f32 %v2009_v49, %v2601_v59 }
 0x194   :  { %v2011_v52 = vpop.f32.mrf.mxu0 }
 0x195   :  { %v2012_v54 = vadd.f32 %v2011_v52, %v2010_v50  ;;  %2081 = vmatprep.mubr.bf16.mxu1 %v521_v51  ;;  %v505_v56 = vmax.f32 %v469_v53, 0.0 }
 0x197   :  { %v472_v55 = vadd.f32 %v2012_v54, %v2601_v59 }
 0x199   :  { %v506_v57 = vmax.f32 %v472_v55, 0.0 }
 0x19b   :  { %v522_v58 = vpack.c.bf16 %v506_v57, %v505_v56 }
 0x19d   :  { %2082 = vmatmul.mubr.bf16.gmra.mxu1 %v522_v58 }
 0x19e   :  { %943 = vmatprep.mubr.bf16.mxu1 %v2535_v60 }
 0x1ed   :  { %v2055_v61 = vpop.f32.mrf.mxu0 }
 0x1ee   :  { %v637_v7 = vadd.f32 %v2055_v61, %v2639_v63 }
 0x1ef   :  { %v628_v62 = vpop.f32.mrf.mxu0 }
 0x1f0   :  { %v629_v1 = vadd.f32 %v2639_v63, %v628_v62  ;;  %v757_v10 = vmax.f32 %v637_v7, 0.0 }
 0x1f1   :  { %v2056_v0 = vpop.f32.mrf.mxu0 }
 0x1f2   :  { %v755_v3 = vmax.f32 %v629_v1, 0.0  ;;  %v640_v5 = vadd.f32 %v2056_v0, %v2639_v63 }
 0x1f3   :  { %v631_v2 = vpop.f32.mrf.mxu0 }
 0x1f4   :  { %v632_v59 = vadd.f32 %v2639_v63, %v631_v2  ;;  %v758_v8 = vmax.f32 %v640_v5, 0.0 }
 0x1f6   :  { %v756_v4 = vmax.f32 %v632_v59, 0.0  ;;  %v788_v12 = vpack.c.bf16 %v758_v8, %v757_v10 }
 0x1f8   :  { %v787_v6 = vpack.c.bf16 %v756_v4, %v755_v3 }
 0x1fa   :  { %944 = vmatmul.mubr.bf16.vlgmr.msra.gmra.mxu1 %v787_v6 }
 0x1fb   :  { %953 = vmatprep.mubr.bf16.mxu1 %v2535_v60 }
 0x1fd   :  { %v2059_v9 = vpop.f32.mrf.mxu0 }
 0x1fe   :  { %v653_v21 = vadd.f32 %v2059_v9, %v2639_v63 }
 0x1ff   :  { %v644_v11 = vpop.f32.mrf.mxu0 }
 0x200   :  { %v645_v14 = vadd.f32 %v2639_v63, %v644_v11  ;;  %v761_v24 = vmax.f32 %v653_v21, 0.0 }
 0x201   :  { %v2060_v13 = vpop.f32.mrf.mxu0 }
 0x202   :  { %954 = vmatmul.mubr.bf16.gmra.mxu1 %v788_v12  ;;  %v759_v17 = vmax.f32 %v645_v14, 0.0  ;;  %v656_v19 = vadd.f32 %v2060_v13, %v2639_v63 }
 0x203   :  { %v647_v15 = vpop.f32.mrf.mxu0  ;;  %963 = vmatprep.mubr.bf16.mxu1 %v2535_v60 }
 0x204   :  { %v648_v16 = vadd.f32 %v2639_v63, %v647_v15  ;;  %v762_v22 = vmax.f32 %v656_v19, 0.0 }
 0x206   :  { %v760_v18 = vmax.f32 %v648_v16, 0.0  ;;  %v790_v26 = vpack.c.bf16 %v762_v22, %v761_v24 }
 0x208   :  { %v789_v20 = vpack.c.bf16 %v760_v18, %v759_v17 }
 0x20a   :  { %964 = vmatmul.mubr.bf16.gmra.mxu1 %v789_v20 }
 0x20b   :  { %973 = vmatprep.mubr.bf16.mxu1 %v2535_v60 }
 0x20d   :  { %v2063_v23 = vpop.f32.mrf.mxu0 }
 0x20e   :  { %v669_v35 = vadd.f32 %v2063_v23, %v2639_v63 }
 0x20f   :  { %v660_v25 = vpop.f32.mrf.mxu0 }
 0x210   :  { %v661_v28 = vadd.f32 %v2639_v63, %v660_v25  ;;  %v765_v38 = vmax.f32 %v669_v35, 0.0 }
 0x211   :  { %v2064_v27 = vpop.f32.mrf.mxu0 }
 0x212   :  { %974 = vmatmul.mubr.bf16.gmra.mxu1 %v790_v26  ;;  %v763_v31 = vmax.f32 %v661_v28, 0.0  ;;  %v672_v33 = vadd.f32 %v2064_v27, %v2639_v63 }
 0x213   :  { %v663_v29 = vpop.f32.mrf.mxu0  ;;  %983 = vmatprep.mubr.bf16.mxu1 %v2535_v60 }
 0x214   :  { %v664_v30 = vadd.f32 %v2639_v63, %v663_v29  ;;  %v766_v36 = vmax.f32 %v672_v33, 0.0 }
 0x216   :  { %v764_v32 = vmax.f32 %v664_v30, 0.0  ;;  %v792_v40 = vpack.c.bf16 %v766_v36, %v765_v38 }
 0x218   :  { %v791_v34 = vpack.c.bf16 %v764_v32, %v763_v31 }
 0x21a   :  { %984 = vmatmul.mubr.bf16.gmra.mxu1 %v791_v34 }
 0x21b   :  { %993 = vmatprep.mubr.bf16.mxu1 %v2535_v60 }
 0x21d   :  { %v2067_v37 = vpop.f32.mrf.mxu0 }
 0x21e   :  { %v685_v49 = vadd.f32 %v2067_v37, %v2639_v63 }
 0x21f   :  { %v676_v39 = vpop.f32.mrf.mxu0 }
 0x220   :  { %v677_v42 = vadd.f32 %v2639_v63, %v676_v39  ;;  %v769_v52 = vmax.f32 %v685_v49, 0.0 }
 0x221   :  { %v2068_v41 = vpop.f32.mrf.mxu0 }
 0x222   :  { %994 = vmatmul.mubr.bf16.gmra.mxu1 %v792_v40  ;;  %v767_v45 = vmax.f32 %v677_v42, 0.0  ;;  %v688_v47 = vadd.f32 %v2068_v41, %v2639_v63 }
 0x223   :  { %v679_v43 = vpop.f32.mrf.mxu0  ;;  %1003 = vmatprep.mubr.bf16.mxu1 %v2535_v60 }
 0x224   :  { %v680_v44 = vadd.f32 %v2639_v63, %v679_v43  ;;  %v770_v50 = vmax.f32 %v688_v47, 0.0  ;;  %v821_v47 = vlaneseq }
 0x226   :  { %v768_v46 = vmax.f32 %v680_v44, 0.0  ;;  %v794_v54 = vpack.c.bf16 %v770_v50, %v769_v52  ;;  %v819_v50 = vld [vmem:[%s2771_s6] sm:$0x3]  ;;  %s2536_s6 = smov [#allocation10]  }
 0x227   :  { %s1717_s27 = sshll.u32 %s2536_s6, 4  ;;  %s1718_s27 = int_to_ptr.vmem [resolvable:$true] %s1717_s27 }
 0x228   :  { %v793_v48 = vpack.c.bf16 %v768_v46, %v767_v45  ;;  %s2497_s28 = scalar_lea.vmem %s1718_s27, 4096  ;;  %p2502_p7 = scmp.lt.s32.totalorder %s1718_s27, %s1718_s27 }
 0x229   :  { %p2498_p6 = scmp.ne.s32.totalorder %s1718_s27, %s2497_s28  ;;  %p2503_p8 = scmp.lt.s32.totalorder %s2497_s28, %s2497_s28 }
 0x22a   :  { %1004 = vmatmul.mubr.bf16.gmra.mxu1 %v793_v48  ;;  %v822_v48 = vshrl.u32 %v821_v47, 7 }
 0x22b   :  { %1013 = vmatprep.mubr.bf16.mxu1 %v2535_v60  ;;  %p2504_p9 = por %p2503_p8, %p2502_p7 }
 0x22c   :  { %v823_v49 = vsub.s32 0, %v822_v48 }
 0x22d   :  { %v2071_v51 = vpop.f32.mrf.mxu1  ;;  %p2505_p10 = pnand %p2504_p9, %p2498_p6 }
 0x22e   :  { %v701_v2 = vadd.f32 %v2071_v51, %v2639_v63  ;;  %v827_v51 = vsub.s32 1, %v822_v48  ;;  %v2691_v52 = vrot.slane %v819_v50, %v823_v49 }
 0x22f   :  { %v692_v53 = vpop.f32.mrf.mxu1 }
 0x230   :  { %v693_v56 = vadd.f32 %v2639_v63, %v692_v53  ;;  %v773_v4 = vmax.f32 %v701_v2, 0.0  ;;  %v2693_v53 = vrot.slane %v819_v50, %v827_v51 }
 0x231   :  { %v2072_v55 = vpop.f32.mrf.mxu1 }
 0x232   :  { %1014 = vmatmul.mubr.bf16.gmra.mxu1 %v794_v54  ;;  %v771_v61 = vmax.f32 %v693_v56, 0.0  ;;  %v704_v0 = vadd.f32 %v2072_v55, %v2639_v63 }
 0x233   :  { %v695_v57 = vpop.f32.mrf.mxu1  ;;  %1023 = vmatprep.mubr.bf16.mxu1 %v2535_v60 }
 0x234   :  { %v696_v58 = vadd.f32 %v2639_v63, %v695_v57  ;;  %v774_v59 = vmax.f32 %v704_v0, 0.0 }
 0x236   :  { %v772_v62 = vmax.f32 %v696_v58, 0.0  ;;  %v796_v6 = vpack.c.bf16 %v774_v59, %v773_v4 }
 0x238   :  { %v795_v1 = vpack.c.bf16 %v772_v62, %v771_v61 }
 0x23a   :  { %1024 = vmatmul.mubr.bf16.gmra.mxu1 %v795_v1 }
 0x23b   :  { %1033 = vmatprep.mubr.bf16.mxu1 %v2535_v60 }
 0x23d   :  { %v2075_v3 = vpop.f32.mrf.mxu1 }
 0x23e   :  { %v717_v15 = vadd.f32 %v2075_v3, %v2639_v63 }
 0x23f   :  { %v708_v5 = vpop.f32.mrf.mxu1 }
 0x240   :  { %v709_v8 = vadd.f32 %v2639_v63, %v708_v5  ;;  %v777_v18 = vmax.f32 %v717_v15, 0.0 }
 0x241   :  { %v2076_v7 = vpop.f32.mrf.mxu1 }
 0x242   :  { %1034 = vmatmul.mubr.bf16.gmra.mxu1 %v796_v6  ;;  %v775_v11 = vmax.f32 %v709_v8, 0.0  ;;  %v720_v13 = vadd.f32 %v2076_v7, %v2639_v63 }
 0x243   :  { %v711_v9 = vpop.f32.mrf.mxu1  ;;  %1043 = vmatprep.mubr.bf16.mxu1 %v2535_v60 }
 0x244   :  { %v712_v10 = vadd.f32 %v2639_v63, %v711_v9  ;;  %v778_v16 = vmax.f32 %v720_v13, 0.0 }
 0x246   :  { %v776_v12 = vmax.f32 %v712_v10, 0.0  ;;  %v798_v20 = vpack.c.bf16 %v778_v16, %v777_v18 }
 0x248   :  { %v797_v14 = vpack.c.bf16 %v776_v12, %v775_v11 }
 0x24a   :  { %1044 = vmatmul.mubr.bf16.gmra.mxu1 %v797_v14 }
 0x24b   :  { %1053 = vmatprep.mubr.bf16.mxu1 %v2535_v60 }
 0x24d   :  { %v2079_v17 = vpop.f32.mrf.mxu1 }
 0x24e   :  { %v733_v29 = vadd.f32 %v2079_v17, %v2639_v63 }
 0x24f   :  { %v724_v19 = vpop.f32.mrf.mxu1 }
 0x250   :  { %v725_v22 = vadd.f32 %v2639_v63, %v724_v19  ;;  %v781_v32 = vmax.f32 %v733_v29, 0.0 }
 0x251   :  { %v2080_v21 = vpop.f32.mrf.mxu1 }
 0x252   :  { %1054 = vmatmul.mubr.bf16.gmra.mxu1 %v798_v20  ;;  %v779_v25 = vmax.f32 %v725_v22, 0.0  ;;  %v736_v27 = vadd.f32 %v2080_v21, %v2639_v63 }
 0x253   :  { %v727_v23 = vpop.f32.mrf.mxu1  ;;  %1063 = vmatprep.mubr.bf16.mxu1 %v2535_v60 }
 0x254   :  { %v728_v24 = vadd.f32 %v2639_v63, %v727_v23  ;;  %v782_v30 = vmax.f32 %v736_v27, 0.0 }
 0x256   :  { %v780_v26 = vmax.f32 %v728_v24, 0.0  ;;  %v800_v34 = vpack.c.bf16 %v782_v30, %v781_v32 }
 0x258   :  { %v799_v28 = vpack.c.bf16 %v780_v26, %v779_v25 }
 0x25a   :  { %1064 = vmatmul.mubr.bf16.gmra.mxu1 %v799_v28 }
 0x25b   :  { %1073 = vmatprep.mubr.bf16.mxu1 %v2535_v60 }
 0x25d   :  { %v2083_v31 = vpop.f32.mrf.mxu1 }
 0x25e   :  { %v749_v43 = vadd.f32 %v2083_v31, %v2639_v63 }
 0x25f   :  { %v740_v33 = vpop.f32.mrf.mxu1 }
 0x260   :  { %v741_v36 = vadd.f32 %v2639_v63, %v740_v33  ;;  %v785_v45 = vmax.f32 %v749_v43, 0.0 }
 0x261   :  { %v2084_v35 = vpop.f32.mrf.mxu1 }
 0x262   :  { %1074 = vmatmul.mubr.bf16.gmra.mxu1 %v800_v34  ;;  %v783_v39 = vmax.f32 %v741_v36, 0.0  ;;  %v752_v41 = vadd.f32 %v2084_v35, %v2639_v63 }
 0x263   :  { %v743_v37 = vpop.f32.mrf.mxu1  ;;  %1083 = vmatprep.mubr.bf16.mxu1 %v2535_v60 }
 0x264   :  { %v744_v38 = vadd.f32 %v2639_v63, %v743_v37  ;;  %v786_v44 = vmax.f32 %v752_v41, 0.0 }
 0x266   :  { %v784_v40 = vmax.f32 %v744_v38, 0.0  ;;  %v802_v46 = vpack.c.bf16 %v786_v44, %v785_v45 }
 0x268   :  { %v801_v42 = vpack.c.bf16 %v784_v40, %v783_v39 }
 0x26a   :  { %1084 = vmatmul.mubr.bf16.gmra.mxu1 %v801_v42 }
 0x26b   :  { %1093 = vmatprep.mubr.bf16.mxu1 %v2535_v60 }
 0x272   :  { %1094 = vmatmul.mubr.bf16.gmra.mxu1 %v802_v46 }
 0x2ba   :  { %v945_v63 = vpop.f32.mrf.mxu1 }
 0x2bb   :  { %v946_v54 = vadd.f32 %v945_v63, %v2691_v52 }
 0x2bc   :  { %v947_v60 = vpop.f32.mrf.mxu1 }
 0x2bd   :  { %v1773_v55 = vmul.f32 -1.442695, %v946_v54  ;;  %v948_v56 = vadd.f32 %v947_v60, %v2693_v53 }
 0x2be   :  { %v949_v57 = vpop.f32.mrf.mxu1 }
 0x2bf   :  { %2161 = vpow2.f32 %v1773_v55  ;;  %v1774_v58 = vmul.f32 -1.442695, %v948_v56  ;;  %v950_v61 = vadd.f32 %v949_v57, %v2691_v52 }
 0x2c0   :  { %v951_v62 = vpop.f32.mrf.mxu1 }
 0x2c1   :  { %2163 = vpow2.f32 %v1774_v58  ;;  %v1775_v0 = vmul.f32 -1.442695, %v950_v61  ;;  %v952_v1 = vadd.f32 %v951_v62, %v2693_v53 }
 0x2c2   :  { %v955_v2 = vpop.f32.mrf.mxu1 }
 0x2c3   :  { %2165 = vpow2.f32 %v1775_v0  ;;  %v1776_v59 = vmul.f32 -1.442695, %v952_v1  ;;  %v956_v3 = vadd.f32 %v955_v2, %v2691_v52 }
 0x2c4   :  { %v957_v4 = vpop.f32.mrf.mxu1 }
 0x2c5   :  { %2167 = vpow2.f32 %v1776_v59  ;;  %v1777_v5 = vmul.f32 -1.442695, %v956_v3  ;;  %v958_v6 = vadd.f32 %v957_v4, %v2693_v53 }
 0x2c6   :  { %v959_v7 = vpop.f32.mrf.mxu1 }
 0x2c7   :  { %2169 = vpow2.f32 %v1777_v5  ;;  %v1778_v8 = vmul.f32 -1.442695, %v958_v6  ;;  %v960_v9 = vadd.f32 %v959_v7, %v2691_v52 }
 0x2c8   :  { %v961_v10 = vpop.f32.mrf.mxu1 }
 0x2c9   :  { %2171 = vpow2.f32 %v1778_v8  ;;  %v1779_v11 = vmul.f32 -1.442695, %v960_v9  ;;  %v962_v12 = vadd.f32 %v961_v10, %v2693_v53 }
 0x2ca   :  { %v965_v13 = vpop.f32.mrf.mxu1 }
 0x2cb   :  { %2173 = vpow2.f32 %v1779_v11  ;;  %v1780_v14 = vmul.f32 -1.442695, %v962_v12  ;;  %v966_v15 = vadd.f32 %v965_v13, %v2691_v52 }
 0x2cc   :  { %v2162_v16 = vpop.eup %2161  ;;  %v967_v17 = vpop.f32.mrf.mxu1 }
 0x2cd   :  { %v1296_v18 = vadd.f32 1.0, %v2162_v16  ;;  %2175 = vpow2.f32 %v1780_v14  ;;  %v1781_v19 = vmul.f32 -1.442695, %v966_v15  ;;  %v968_v20 = vadd.f32 %v967_v17, %v2693_v53 }
 0x2ce   :  { %v2164_v21 = vpop.eup %2163  ;;  %v969_v22 = vpop.f32.mrf.mxu1 }
 0x2cf   :  { %2177 = vrcp.f32 %v1296_v18  ;;  %v1297_v23 = vadd.f32 1.0, %v2164_v21  ;;  %v1782_v24 = vmul.f32 -1.442695, %v968_v20  ;;  %v970_v25 = vadd.f32 %v969_v22, %v2691_v52 }
 0x2d0   :  { %v2166_v26 = vpop.eup %2165  ;;  %2179 = vpow2.f32 %v1781_v19  ;;  %v971_v27 = vpop.f32.mrf.mxu1 }
 0x2d1   :  { %2181 = vrcp.f32 %v1297_v23  ;;  %v1298_v28 = vadd.f32 1.0, %v2166_v26  ;;  %v1783_v29 = vmul.f32 -1.442695, %v970_v25  ;;  %v972_v30 = vadd.f32 %v971_v27, %v2693_v53 }
 0x2d2   :  { %v2168_v31 = vpop.eup %2167  ;;  %2183 = vpow2.f32 %v1782_v24  ;;  %v975_v32 = vpop.f32.mrf.mxu1 }
 0x2d3   :  { %2185 = vrcp.f32 %v1298_v28  ;;  %v1299_v33 = vadd.f32 1.0, %v2168_v31  ;;  %v1784_v34 = vmul.f32 -1.442695, %v972_v30  ;;  %v976_v35 = vadd.f32 %v975_v32, %v2691_v52 }
 0x2d4   :  { %v2170_v36 = vpop.eup %2169  ;;  %2187 = vpow2.f32 %v1783_v29  ;;  %v977_v37 = vpop.f32.mrf.mxu1 }
 0x2d5   :  { %2189 = vrcp.f32 %v1299_v33  ;;  %v1300_v38 = vadd.f32 1.0, %v2170_v36  ;;  %v1785_v39 = vmul.f32 -1.442695, %v976_v35  ;;  %v978_v40 = vadd.f32 %v977_v37, %v2693_v53 }
 0x2d6   :  { %v2172_v41 = vpop.eup %2171  ;;  %2191 = vpow2.f32 %v1784_v34  ;;  %v979_v42 = vpop.f32.mrf.mxu1 }
 0x2d7   :  { %2193 = vrcp.f32 %v1300_v38  ;;  %v1301_v43 = vadd.f32 1.0, %v2172_v41  ;;  %v1786_v44 = vmul.f32 -1.442695, %v978_v40  ;;  %v980_v45 = vadd.f32 %v979_v42, %v2691_v52 }
 0x2d8   :  { %v2174_v46 = vpop.eup %2173  ;;  %2195 = vpow2.f32 %v1785_v39  ;;  %v981_v47 = vpop.f32.mrf.mxu1 }
 0x2d9   :  { %2197 = vrcp.f32 %v1301_v43  ;;  %v1302_v48 = vadd.f32 1.0, %v2174_v46  ;;  %v1787_v49 = vmul.f32 -1.442695, %v980_v45  ;;  %v982_v50 = vadd.f32 %v981_v47, %v2693_v53 }
 0x2da   :  { %v2176_v51 = vpop.eup %2175  ;;  %2199 = vpow2.f32 %v1786_v44  ;;  %v985_v63 = vpop.f32.mrf.mxu1 }
 0x2db   :  { %2201 = vrcp.f32 %v1302_v48  ;;  %v1303_v54 = vadd.f32 1.0, %v2176_v51  ;;  %v1788_v60 = vmul.f32 -1.442695, %v982_v50  ;;  %v986_v55 = vadd.f32 %v985_v63, %v2691_v52 }
 0x2dc   :  { %v2178_v56 = vpop.eup %2177  ;;  %2203 = vpow2.f32 %v1787_v49  ;;  %v987_v57 = vpop.f32.mrf.mxu1 }
 0x2dd   :  { %v2180_v58 = vpop.eup %2179  ;;  %2205 = vrcp.f32 %v1303_v54  ;;  %v1789_v61 = vmul.f32 -1.442695, %v986_v55  ;;  %v988_v62 = vadd.f32 %v987_v57, %v2693_v53 }
 0x2de   :  { %v2182_v0 = vpop.eup %2181  ;;  %v1304_v1 = vadd.f32 1.0, %v2180_v58  ;;  %2207 = vpow2.f32 %v1788_v60  ;;  %v989_v2 = vpop.f32.mrf.mxu1 }
 0x2df   :  { %v2184_v59 = vpop.eup %2183  ;;  %v1869_v3 = vpack.c.bf16 %v2182_v0, %v2178_v56  ;;  %2209 = vpow2.f32 %v1789_v61  ;;  %v1790_v4 = vmul.f32 -1.442695, %v988_v62  ;;  %v990_v5 = vadd.f32 %v989_v2, %v2691_v52 }
 0x2e0   :  { %v2186_v6 = vpop.eup %2185  ;;  %2211 = vrcp.f32 %v1304_v1  ;;  %v1305_v7 = vadd.f32 1.0, %v2184_v59  ;;  %v991_v8 = vpop.f32.mrf.mxu1 }
 0x2e1   :  { %v2188_v9 = vpop.eup %2187  ;;  %1680 = vst [vmem:[#allocation10] sm:$0xff] %v1869_v3  ;;  %2213 = vpow2.f32 %v1790_v4  ;;  %v1791_v10 = vmul.f32 -1.442695, %v990_v5  ;;  %v992_v11 = vadd.f32 %v991_v8, %v2693_v53 }
 0x2e2   :  { %v2190_v12 = vpop.eup %2189  ;;  %2215 = vrcp.f32 %v1305_v7  ;;  %v1306_v13 = vadd.f32 1.0, %v2188_v9  ;;  %v995_v14 = vpop.f32.mrf.mxu1 }
 0x2e3   :  { %v2192_v15 = vpop.eup %2191  ;;  %v1870_v16 = vpack.c.bf16 %v2190_v12, %v2186_v6  ;;  %2217 = vpow2.f32 %v1791_v10  ;;  %v1792_v17 = vmul.f32 -1.442695, %v992_v11  ;;  %v996_v18 = vadd.f32 %v995_v14, %v2691_v52 }
 0x2e4   :  { %v2194_v19 = vpop.eup %2193  ;;  %2219 = vrcp.f32 %v1306_v13  ;;  %v1307_v20 = vadd.f32 1.0, %v2192_v15  ;;  %v997_v21 = vpop.f32.mrf.mxu1 }
 0x2e5   :  { %v2196_v22 = vpop.eup %2195  ;;  %1681 = vst [vmem:[#allocation10 + $0x8] sm:$0xff] %v1870_v16  ;;  %2221 = vpow2.f32 %v1792_v17  ;;  %v1793_v23 = vmul.f32 -1.442695, %v996_v18  ;;  %v998_v24 = vadd.f32 %v997_v21, %v2693_v53 }
 0x2e6   :  { %v2198_v25 = vpop.eup %2197  ;;  %2223 = vrcp.f32 %v1307_v20  ;;  %v1308_v26 = vadd.f32 1.0, %v2196_v22  ;;  %v999_v27 = vpop.f32.mrf.mxu1 }
 0x2e7   :  { %v2200_v28 = vpop.eup %2199  ;;  %v1871_v29 = vpack.c.bf16 %v2198_v25, %v2194_v19  ;;  %2225 = vpow2.f32 %v1793_v23  ;;  %v1794_v30 = vmul.f32 -1.442695, %v998_v24  ;;  %v1000_v31 = vadd.f32 %v999_v27, %v2691_v52 }
 0x2e8   :  { %v2202_v32 = vpop.eup %2201  ;;  %2227 = vrcp.f32 %v1308_v26  ;;  %v1309_v33 = vadd.f32 1.0, %v2200_v28  ;;  %v1001_v34 = vpop.f32.mrf.mxu1 }
 0x2e9   :  { %v2204_v35 = vpop.eup %2203  ;;  %1682 = vst [vmem:[#allocation10 + $0x10] sm:$0xff] %v1871_v29  ;;  %2229 = vpow2.f32 %v1794_v30  ;;  %v1795_v36 = vmul.f32 -1.442695, %v1000_v31  ;;  %v1002_v37 = vadd.f32 %v1001_v34, %v2693_v53 }
 0x2ea   :  { %v2206_v38 = vpop.eup %2205  ;;  %2231 = vrcp.f32 %v1309_v33  ;;  %v1310_v39 = vadd.f32 1.0, %v2204_v35  ;;  %v1005_v40 = vpop.f32.mrf.mxu1 }
 0x2eb   :  { %v2208_v41 = vpop.eup %2207  ;;  %v1872_v42 = vpack.c.bf16 %v2206_v38, %v2202_v32  ;;  %2233 = vpow2.f32 %v1795_v36  ;;  %v1796_v43 = vmul.f32 -1.442695, %v1002_v37  ;;  %v1006_v44 = vadd.f32 %v1005_v40, %v2691_v52 }
 0x2ec   :  { %v2210_v45 = vpop.eup %2209  ;;  %2235 = vrcp.f32 %v1310_v39  ;;  %v1311_v46 = vadd.f32 1.0, %v2208_v41  ;;  %v1007_v47 = vpop.f32.mrf.mxu1 }
 0x2ed   :  { %v2212_v48 = vpop.eup %2211  ;;  %1683 = vst [vmem:[#allocation10 + $0x18] sm:$0xff] %v1872_v42  ;;  %v1312_v49 = vadd.f32 1.0, %v2210_v45  ;;  %2237 = vpow2.f32 %v1796_v43  ;;  %v1797_v50 = vmul.f32 -1.442695, %v1006_v44  ;;  %v1008_v51 = vadd.f32 %v1007_v47, %v2693_v53 }
 0x2ee   :  { %v2214_v63 = vpop.eup %2213  ;;  %2239 = vrcp.f32 %v1311_v46  ;;  %v1009_v54 = vpop.f32.mrf.mxu1 }
 0x2ef   :  { %v2216_v60 = vpop.eup %2215  ;;  %2241 = vrcp.f32 %v1312_v49  ;;  %v1313_v55 = vadd.f32 1.0, %v2214_v63  ;;  %v1798_v56 = vmul.f32 -1.442695, %v1008_v51  ;;  %v1010_v57 = vadd.f32 %v1009_v54, %v2691_v52 }
 0x2f0   :  { %v2218_v58 = vpop.eup %2217  ;;  %v1873_v61 = vpack.c.bf16 %v2216_v60, %v2212_v48  ;;  %2243 = vpow2.f32 %v1797_v50  ;;  %v1011_v62 = vpop.f32.mrf.mxu1 }
 0x2f1   :  { %v2220_v0 = vpop.eup %2219  ;;  %2245 = vrcp.f32 %v1313_v55  ;;  %v1314_v1 = vadd.f32 1.0, %v2218_v58  ;;  %v1799_v2 = vmul.f32 -1.442695, %v1010_v57  ;;  %v1012_v59 = vadd.f32 %v1011_v62, %v2693_v53 }
 0x2f2   :  { %v2222_v3 = vpop.eup %2221  ;;  %1684 = vst [vmem:[#allocation10 + $0x20] sm:$0xff] %v1873_v61  ;;  %2247 = vpow2.f32 %v1798_v56  ;;  %v1015_v4 = vpop.f32.mrf.mxu1 }
 0x2f3   :  { %v2224_v5 = vpop.eup %2223  ;;  %2249 = vrcp.f32 %v1314_v1  ;;  %v1315_v6 = vadd.f32 1.0, %v2222_v3  ;;  %v1800_v7 = vmul.f32 -1.442695, %v1012_v59  ;;  %v1016_v8 = vadd.f32 %v1015_v4, %v2691_v52 }
 0x2f4   :  { %v2226_v9 = vpop.eup %2225  ;;  %v1874_v10 = vpack.c.bf16 %v2224_v5, %v2220_v0  ;;  %2251 = vpow2.f32 %v1799_v2  ;;  %v1017_v11 = vpop.f32.mrf.mxu1 }
 0x2f5   :  { %v2228_v12 = vpop.eup %2227  ;;  %2253 = vrcp.f32 %v1315_v6  ;;  %v1316_v13 = vadd.f32 1.0, %v2226_v9  ;;  %v1801_v14 = vmul.f32 -1.442695, %v1016_v8  ;;  %v1018_v15 = vadd.f32 %v1017_v11, %v2693_v53 }
 0x2f6   :  { %v2230_v16 = vpop.eup %2229  ;;  %1685 = vst [vmem:[#allocation10 + $0x28] sm:$0xff] %v1874_v10  ;;  %2255 = vpow2.f32 %v1800_v7  ;;  %v1019_v17 = vpop.f32.mrf.mxu1 }
 0x2f7   :  { %v2232_v18 = vpop.eup %2231  ;;  %2257 = vrcp.f32 %v1316_v13  ;;  %v1317_v19 = vadd.f32 1.0, %v2230_v16  ;;  %v1802_v20 = vmul.f32 -1.442695, %v1018_v15  ;;  %v1020_v21 = vadd.f32 %v1019_v17, %v2691_v52 }
 0x2f8   :  { %v2234_v22 = vpop.eup %2233  ;;  %v1875_v23 = vpack.c.bf16 %v2232_v18, %v2228_v12  ;;  %2259 = vpow2.f32 %v1801_v14  ;;  %v1021_v24 = vpop.f32.mrf.mxu1 }
 0x2f9   :  { %v2236_v25 = vpop.eup %2235  ;;  %2261 = vrcp.f32 %v1317_v19  ;;  %v1318_v26 = vadd.f32 1.0, %v2234_v22  ;;  %v1803_v27 = vmul.f32 -1.442695, %v1020_v21  ;;  %v1022_v28 = vadd.f32 %v1021_v24, %v2693_v53 }
 0x2fa   :  { %v2238_v29 = vpop.eup %2237  ;;  %1686 = vst [vmem:[#allocation10 + $0x30] sm:$0xff] %v1875_v23  ;;  %2263 = vpow2.f32 %v1802_v20  ;;  %v1025_v30 = vpop.f32.mrf.mxu1 }
 0x2fb   :  { %v2240_v31 = vpop.eup %2239  ;;  %2265 = vrcp.f32 %v1318_v26  ;;  %v1319_v32 = vadd.f32 1.0, %v2238_v29  ;;  %v1804_v33 = vmul.f32 -1.442695, %v1022_v28  ;;  %v1026_v34 = vadd.f32 %v1025_v30, %v2691_v52 }
 0x2fc   :  { %v2242_v35 = vpop.eup %2241  ;;  %v1876_v36 = vpack.c.bf16 %v2240_v31, %v2236_v25  ;;  %2267 = vpow2.f32 %v1803_v27  ;;  %v1027_v37 = vpop.f32.mrf.mxu1 }
 0x2fd   :  { %v2244_v38 = vpop.eup %2243  ;;  %2269 = vrcp.f32 %v1319_v32  ;;  %v1805_v39 = vmul.f32 -1.442695, %v1026_v34  ;;  %v1028_v40 = vadd.f32 %v1027_v37, %v2693_v53 }
 0x2fe   :  { %v2246_v41 = vpop.eup %2245  ;;  %1687 = vst [vmem:[#allocation10 + $0x38] sm:$0xff] %v1876_v36  ;;  %v1320_v42 = vadd.f32 1.0, %v2244_v38  ;;  %2271 = vpow2.f32 %v1804_v33  ;;  %v1029_v43 = vpop.f32.mrf.mxu1 }
 0x2ff   :  { %v2248_v44 = vpop.eup %2247  ;;  %v1877_v45 = vpack.c.bf16 %v2246_v41, %v2242_v35  ;;  %2273 = vpow2.f32 %v1805_v39  ;;  %v1806_v46 = vmul.f32 -1.442695, %v1028_v40  ;;  %v1030_v47 = vadd.f32 %v1029_v43, %v2691_v52 }
 0x300   :  { %v2250_v48 = vpop.eup %2249  ;;  %2275 = vrcp.f32 %v1320_v42  ;;  %v1321_v49 = vadd.f32 1.0, %v2248_v44  ;;  %v1031_v50 = vpop.f32.mrf.mxu1 }
 0x301   :  { %v2252_v51 = vpop.eup %2251  ;;  %1688 = vst [vmem:[#allocation10 + $0x40] sm:$0xff] %v1877_v45  ;;  %2277 = vpow2.f32 %v1806_v46  ;;  %v1807_v63 = vmul.f32 -1.442695, %v1030_v47  ;;  %v1032_v54 = vadd.f32 %v1031_v50, %v2693_v53 }
 0x302   :  { %v2254_v60 = vpop.eup %2253  ;;  %2279 = vrcp.f32 %v1321_v49  ;;  %v1322_v55 = vadd.f32 1.0, %v2252_v51  ;;  %v1035_v56 = vpop.f32.mrf.mxu1 }
 0x303   :  { %v2256_v57 = vpop.eup %2255  ;;  %v1878_v58 = vpack.c.bf16 %v2254_v60, %v2250_v48  ;;  %2281 = vpow2.f32 %v1807_v63  ;;  %v1808_v61 = vmul.f32 -1.442695, %v1032_v54  ;;  %v1036_v62 = vadd.f32 %v1035_v56, %v2691_v52 }
 0x304   :  { %v2258_v0 = vpop.eup %2257  ;;  %2283 = vrcp.f32 %v1322_v55  ;;  %v1323_v1 = vadd.f32 1.0, %v2256_v57  ;;  %v1037_v2 = vpop.f32.mrf.mxu1 }
 0x305   :  { %v2260_v59 = vpop.eup %2259  ;;  %1689 = vst [vmem:[#allocation10 + $0x48] sm:$0xff] %v1878_v58  ;;  %2285 = vpow2.f32 %v1808_v61  ;;  %v1809_v3 = vmul.f32 -1.442695, %v1036_v62  ;;  %v1038_v4 = vadd.f32 %v1037_v2, %v2693_v53 }
 0x306   :  { %v2262_v5 = vpop.eup %2261  ;;  %2287 = vrcp.f32 %v1323_v1  ;;  %v1324_v6 = vadd.f32 1.0, %v2260_v59  ;;  %v1039_v7 = vpop.f32.mrf.mxu1 }
 0x307   :  { %v2264_v8 = vpop.eup %2263  ;;  %v1879_v9 = vpack.c.bf16 %v2262_v5, %v2258_v0  ;;  %2289 = vpow2.f32 %v1809_v3  ;;  %v1810_v10 = vmul.f32 -1.442695, %v1038_v4  ;;  %v1040_v11 = vadd.f32 %v1039_v7, %v2691_v52 }
 0x308   :  { %v2266_v12 = vpop.eup %2265  ;;  %2291 = vrcp.f32 %v1324_v6  ;;  %v1325_v13 = vadd.f32 1.0, %v2264_v8  ;;  %v1041_v14 = vpop.f32.mrf.mxu1 }
 0x309   :  { %v2268_v15 = vpop.eup %2267  ;;  %1690 = vst [vmem:[#allocation10 + $0x50] sm:$0xff] %v1879_v9  ;;  %2293 = vpow2.f32 %v1810_v10  ;;  %v1811_v16 = vmul.f32 -1.442695, %v1040_v11  ;;  %v1042_v17 = vadd.f32 %v1041_v14, %v2693_v53 }
 0x30a   :  { %v2270_v18 = vpop.eup %2269  ;;  %2295 = vrcp.f32 %v1325_v13  ;;  %v1326_v19 = vadd.f32 1.0, %v2268_v15  ;;  %v1045_v20 = vpop.f32.mrf.mxu1 }
 0x30b   :  { %v2272_v21 = vpop.eup %2271  ;;  %v1880_v22 = vpack.c.bf16 %v2270_v18, %v2266_v12  ;;  %2297 = vpow2.f32 %v1811_v16  ;;  %v1812_v23 = vmul.f32 -1.442695, %v1042_v17  ;;  %v1046_v24 = vadd.f32 %v1045_v20, %v2691_v52 }
 0x30c   :  { %v2274_v25 = vpop.eup %2273  ;;  %2299 = vrcp.f32 %v1326_v19  ;;  %v1327_v26 = vadd.f32 1.0, %v2272_v21  ;;  %v1047_v27 = vpop.f32.mrf.mxu1 }
 0x30d   :  { %v2276_v28 = vpop.eup %2275  ;;  %1691 = vst [vmem:[#allocation10 + $0x58] sm:$0xff] %v1880_v22  ;;  %v1328_v29 = vadd.f32 1.0, %v2274_v25  ;;  %2301 = vpow2.f32 %v1812_v23  ;;  %v1813_v30 = vmul.f32 -1.442695, %v1046_v24  ;;  %v1048_v31 = vadd.f32 %v1047_v27, %v2693_v53 }
 0x30e   :  { %v2278_v32 = vpop.eup %2277  ;;  %2303 = vrcp.f32 %v1327_v26  ;;  %v1049_v33 = vpop.f32.mrf.mxu1 }
 0x30f   :  { %v2280_v34 = vpop.eup %2279  ;;  %2305 = vrcp.f32 %v1328_v29  ;;  %v1329_v35 = vadd.f32 1.0, %v2278_v32  ;;  %v1814_v36 = vmul.f32 -1.442695, %v1048_v31  ;;  %v1050_v37 = vadd.f32 %v1049_v33, %v2691_v52 }
 0x310   :  { %v2282_v38 = vpop.eup %2281  ;;  %v1881_v39 = vpack.c.bf16 %v2280_v34, %v2276_v28  ;;  %2307 = vpow2.f32 %v1813_v30  ;;  %v1051_v40 = vpop.f32.mrf.mxu1 }
 0x311   :  { %v2284_v41 = vpop.eup %2283  ;;  %2309 = vrcp.f32 %v1329_v35  ;;  %v1330_v42 = vadd.f32 1.0, %v2282_v38  ;;  %v1815_v43 = vmul.f32 -1.442695, %v1050_v37  ;;  %v1052_v44 = vadd.f32 %v1051_v40, %v2693_v53 }
 0x312   :  { %v2286_v45 = vpop.eup %2285  ;;  %1692 = vst [vmem:[#allocation10 + $0x60] sm:$0xff] %v1881_v39  ;;  %2311 = vpow2.f32 %v1814_v36  ;;  %v1055_v46 = vpop.f32.mrf.mxu1 }
 0x313   :  { %v2288_v47 = vpop.eup %2287  ;;  %2313 = vrcp.f32 %v1330_v42  ;;  %v1331_v48 = vadd.f32 1.0, %v2286_v45  ;;  %v1816_v49 = vmul.f32 -1.442695, %v1052_v44  ;;  %v1056_v50 = vadd.f32 %v1055_v46, %v2691_v52 }
 0x314   :  { %v2290_v51 = vpop.eup %2289  ;;  %v1882_v63 = vpack.c.bf16 %v2288_v47, %v2284_v41  ;;  %2315 = vpow2.f32 %v1815_v43  ;;  %v1057_v54 = vpop.f32.mrf.mxu1 }
 0x315   :  { %v2292_v60 = vpop.eup %2291  ;;  %2317 = vrcp.f32 %v1331_v48  ;;  %v1332_v55 = vadd.f32 1.0, %v2290_v51  ;;  %v1817_v56 = vmul.f32 -1.442695, %v1056_v50  ;;  %v1058_v57 = vadd.f32 %v1057_v54, %v2693_v53 }
 0x316   :  { %v2294_v58 = vpop.eup %2293  ;;  %1693 = vst [vmem:[#allocation10 + $0x68] sm:$0xff] %v1882_v63  ;;  %2319 = vpow2.f32 %v1816_v49  ;;  %v1059_v61 = vpop.f32.mrf.mxu1 }
 0x317   :  { %v2296_v62 = vpop.eup %2295  ;;  %2321 = vrcp.f32 %v1332_v55  ;;  %v1333_v0 = vadd.f32 1.0, %v2294_v58  ;;  %v1818_v1 = vmul.f32 -1.442695, %v1058_v57  ;;  %v1060_v2 = vadd.f32 %v1059_v61, %v2691_v52 }
 0x318   :  { %v2298_v59 = vpop.eup %2297  ;;  %v1883_v3 = vpack.c.bf16 %v2296_v62, %v2292_v60  ;;  %2323 = vpow2.f32 %v1817_v56  ;;  %v1061_v4 = vpop.f32.mrf.mxu1 }
 0x319   :  { %v2300_v5 = vpop.eup %2299  ;;  %2325 = vrcp.f32 %v1333_v0  ;;  %v1334_v6 = vadd.f32 1.0, %v2298_v59  ;;  %v1819_v7 = vmul.f32 -1.442695, %v1060_v2  ;;  %v1062_v8 = vadd.f32 %v1061_v4, %v2693_v53 }
 0x31a   :  { %v2302_v9 = vpop.eup %2301  ;;  %1694 = vst [vmem:[#allocation10 + $0x70] sm:$0xff] %v1883_v3  ;;  %2327 = vpow2.f32 %v1818_v1  ;;  %v1065_v10 = vpop.f32.mrf.mxu1 }
 0x31b   :  { %v2304_v11 = vpop.eup %2303  ;;  %2329 = vrcp.f32 %v1334_v6  ;;  %v1335_v12 = vadd.f32 1.0, %v2302_v9  ;;  %v1820_v13 = vmul.f32 -1.442695, %v1062_v8  ;;  %v1066_v14 = vadd.f32 %v1065_v10, %v2691_v52 }
 0x31c   :  { %v2306_v15 = vpop.eup %2305  ;;  %v1884_v16 = vpack.c.bf16 %v2304_v11, %v2300_v5  ;;  %2331 = vpow2.f32 %v1819_v7  ;;  %v1067_v17 = vpop.f32.mrf.mxu1 }
 0x31d   :  { %v2308_v18 = vpop.eup %2307  ;;  %2333 = vrcp.f32 %v1335_v12  ;;  %v1821_v19 = vmul.f32 -1.442695, %v1066_v14  ;;  %v1068_v20 = vadd.f32 %v1067_v17, %v2693_v53 }
 0x31e   :  { %v2310_v21 = vpop.eup %2309  ;;  %1695 = vst [vmem:[#allocation10 + $0x78] sm:$0xff] %v1884_v16  ;;  %v1336_v22 = vadd.f32 1.0, %v2308_v18  ;;  %2335 = vpow2.f32 %v1820_v13  ;;  %v1069_v23 = vpop.f32.mrf.mxu1 }
 0x31f   :  { %v2312_v24 = vpop.eup %2311  ;;  %v1885_v25 = vpack.c.bf16 %v2310_v21, %v2306_v15  ;;  %2337 = vpow2.f32 %v1821_v19  ;;  %v1822_v26 = vmul.f32 -1.442695, %v1068_v20  ;;  %v1070_v27 = vadd.f32 %v1069_v23, %v2691_v52 }
 0x320   :  { %v2314_v28 = vpop.eup %2313  ;;  %2339 = vrcp.f32 %v1336_v22  ;;  %v1337_v29 = vadd.f32 1.0, %v2312_v24  ;;  %v1071_v30 = vpop.f32.mrf.mxu1 }
 0x321   :  { %v2316_v31 = vpop.eup %2315  ;;  %1696 = vst [vmem:[#allocation10 + $0x80] sm:$0xff] %v1885_v25  ;;  %2341 = vpow2.f32 %v1822_v26  ;;  %v1823_v32 = vmul.f32 -1.442695, %v1070_v27  ;;  %v1072_v33 = vadd.f32 %v1071_v30, %v2693_v53 }
 0x322   :  { %v2318_v34 = vpop.eup %2317  ;;  %2343 = vrcp.f32 %v1337_v29  ;;  %v1338_v35 = vadd.f32 1.0, %v2316_v31  ;;  %v1075_v36 = vpop.f32.mrf.mxu1 }
 0x323   :  { %v2320_v37 = vpop.eup %2319  ;;  %v1886_v38 = vpack.c.bf16 %v2318_v34, %v2314_v28  ;;  %2345 = vpow2.f32 %v1823_v32  ;;  %v1824_v39 = vmul.f32 -1.442695, %v1072_v33  ;;  %v1076_v40 = vadd.f32 %v1075_v36, %v2691_v52 }
 0x324   :  { %v2322_v41 = vpop.eup %2321  ;;  %2347 = vrcp.f32 %v1338_v35  ;;  %v1339_v42 = vadd.f32 1.0, %v2320_v37  ;;  %v1077_v43 = vpop.f32.mrf.mxu1 }
 0x325   :  { %v2324_v44 = vpop.eup %2323  ;;  %1697 = vst [vmem:[#allocation10 + $0x88] sm:$0xff] %v1886_v38  ;;  %2349 = vpow2.f32 %v1824_v39  ;;  %v1825_v45 = vmul.f32 -1.442695, %v1076_v40  ;;  %v1078_v46 = vadd.f32 %v1077_v43, %v2693_v53 }
 0x326   :  { %v2326_v47 = vpop.eup %2325  ;;  %2351 = vrcp.f32 %v1339_v42  ;;  %v1340_v48 = vadd.f32 1.0, %v2324_v44  ;;  %v1079_v49 = vpop.f32.mrf.mxu1 }
 0x327   :  { %v2328_v50 = vpop.eup %2327  ;;  %v1887_v51 = vpack.c.bf16 %v2326_v47, %v2322_v41  ;;  %2353 = vpow2.f32 %v1825_v45  ;;  %v1826_v63 = vmul.f32 -1.442695, %v1078_v46  ;;  %v1080_v54 = vadd.f32 %v1079_v49, %v2691_v52 }
 0x328   :  { %v2330_v60 = vpop.eup %2329  ;;  %2355 = vrcp.f32 %v1340_v48  ;;  %v1341_v55 = vadd.f32 1.0, %v2328_v50  ;;  %v1081_v56 = vpop.f32.mrf.mxu1 }
 0x329   :  { %v2332_v57 = vpop.eup %2331  ;;  %1698 = vst [vmem:[#allocation10 + $0x90] sm:$0xff] %v1887_v51  ;;  %2357 = vpow2.f32 %v1826_v63  ;;  %v1827_v58 = vmul.f32 -1.442695, %v1080_v54  ;;  %v1082_v61 = vadd.f32 %v1081_v56, %v2693_v53 }
 0x32a   :  { %v2334_v62 = vpop.eup %2333  ;;  %2359 = vrcp.f32 %v1341_v55  ;;  %v1342_v0 = vadd.f32 1.0, %v2332_v57  ;;  %v1085_v1 = vpop.f32.mrf.mxu1 }
 0x32b   :  { %v2336_v2 = vpop.eup %2335  ;;  %v1888_v59 = vpack.c.bf16 %v2334_v62, %v2330_v60  ;;  %2361 = vpow2.f32 %v1827_v58  ;;  %v1828_v3 = vmul.f32 -1.442695, %v1082_v61  ;;  %v1086_v4 = vadd.f32 %v1085_v1, %v2691_v52 }
 0x32c   :  { %v2338_v5 = vpop.eup %2337  ;;  %2363 = vrcp.f32 %v1342_v0  ;;  %v1343_v6 = vadd.f32 1.0, %v2336_v2  ;;  %v1087_v7 = vpop.f32.mrf.mxu1 }
 0x32d   :  { %v2340_v8 = vpop.eup %2339  ;;  %1699 = vst [vmem:[#allocation10 + $0x98] sm:$0xff] %v1888_v59  ;;  %v1344_v9 = vadd.f32 1.0, %v2338_v5  ;;  %2365 = vpow2.f32 %v1828_v3  ;;  %v1829_v10 = vmul.f32 -1.442695, %v1086_v4  ;;  %v1088_v11 = vadd.f32 %v1087_v7, %v2693_v53 }
 0x32e   :  { %v2342_v12 = vpop.eup %2341  ;;  %2367 = vrcp.f32 %v1343_v6  ;;  %v1089_v13 = vpop.f32.mrf.mxu1 }
 0x32f   :  { %v2344_v14 = vpop.eup %2343  ;;  %2369 = vrcp.f32 %v1344_v9  ;;  %v1345_v15 = vadd.f32 1.0, %v2342_v12  ;;  %v1830_v16 = vmul.f32 -1.442695, %v1088_v11  ;;  %v1090_v17 = vadd.f32 %v1089_v13, %v2691_v52 }
 0x330   :  { %v2346_v18 = vpop.eup %2345  ;;  %v1889_v19 = vpack.c.bf16 %v2344_v14, %v2340_v8  ;;  %2371 = vpow2.f32 %v1829_v10  ;;  %v1091_v20 = vpop.f32.mrf.mxu1 }
 0x331   :  { %v2348_v21 = vpop.eup %2347  ;;  %2373 = vrcp.f32 %v1345_v15  ;;  %v1346_v22 = vadd.f32 1.0, %v2346_v18  ;;  %v1831_v23 = vmul.f32 -1.442695, %v1090_v17  ;;  %v1092_v24 = vadd.f32 %v1091_v20, %v2693_v53 }
 0x332   :  { %v2350_v25 = vpop.eup %2349  ;;  %1700 = vst [vmem:[#allocation10 + $0xa0] sm:$0xff] %v1889_v19  ;;  %2375 = vpow2.f32 %v1830_v16  ;;  %v1095_v26 = vpop.f32.mrf.mxu1 }
 0x333   :  { %v2352_v27 = vpop.eup %2351  ;;  %2377 = vrcp.f32 %v1346_v22  ;;  %v1347_v28 = vadd.f32 1.0, %v2350_v25  ;;  %v1832_v29 = vmul.f32 -1.442695, %v1092_v24  ;;  %v1096_v30 = vadd.f32 %v1095_v26, %v2691_v52 }
 0x334   :  { %v2354_v31 = vpop.eup %2353  ;;  %v1890_v32 = vpack.c.bf16 %v2352_v27, %v2348_v21  ;;  %2379 = vpow2.f32 %v1831_v23  ;;  %v1097_v33 = vpop.f32.mrf.mxu1 }
 0x335   :  { %v2356_v34 = vpop.eup %2355  ;;  %2381 = vrcp.f32 %v1347_v28  ;;  %v1348_v35 = vadd.f32 1.0, %v2354_v31  ;;  %v1833_v36 = vmul.f32 -1.442695, %v1096_v30  ;;  %v1098_v37 = vadd.f32 %v1097_v33, %v2693_v53 }
 0x336   :  { %v2358_v38 = vpop.eup %2357  ;;  %1701 = vst [vmem:[#allocation10 + $0xa8] sm:$0xff] %v1890_v32  ;;  %2383 = vpow2.f32 %v1832_v29  ;;  %v1099_v39 = vpop.f32.mrf.mxu1 }
 0x337   :  { %v2360_v40 = vpop.eup %2359  ;;  %2385 = vrcp.f32 %v1348_v35  ;;  %v1349_v41 = vadd.f32 1.0, %v2358_v38  ;;  %v1834_v42 = vmul.f32 -1.442695, %v1098_v37  ;;  %v1100_v43 = vadd.f32 %v1099_v39, %v2691_v52 }
 0x338   :  { %v2362_v44 = vpop.eup %2361  ;;  %v1891_v45 = vpack.c.bf16 %v2360_v40, %v2356_v34  ;;  %2387 = vpow2.f32 %v1833_v36  ;;  %v1101_v46 = vpop.f32.mrf.mxu1 }
 0x339   :  { %v2364_v47 = vpop.eup %2363  ;;  %2389 = vrcp.f32 %v1349_v41  ;;  %v1350_v48 = vadd.f32 1.0, %v2362_v44  ;;  %v1835_v49 = vmul.f32 -1.442695, %v1100_v43  ;;  %v1102_v50 = vadd.f32 %v1101_v46, %v2693_v53 }
 0x33a   :  { %v2366_v51 = vpop.eup %2365  ;;  %1702 = vst [vmem:[#allocation10 + $0xb0] sm:$0xff] %v1891_v45  ;;  %2391 = vpow2.f32 %v1834_v42 }
 0x33b   :  { %v2368_v63 = vpop.eup %2367  ;;  %2393 = vrcp.f32 %v1350_v48  ;;  %v1351_v54 = vadd.f32 1.0, %v2366_v51  ;;  %v1836_v60 = vmul.f32 -1.442695, %v1102_v50 }
 0x33c   :  { %v2370_v55 = vpop.eup %2369  ;;  %v1892_v56 = vpack.c.bf16 %v2368_v63, %v2364_v47  ;;  %2395 = vpow2.f32 %v1835_v49 }
 0x33d   :  { %v2372_v52 = vpop.eup %2371  ;;  %2397 = vrcp.f32 %v1351_v54 }
 0x33e   :  { %v2374_v57 = vpop.eup %2373  ;;  %1703 = vst [vmem:[#allocation10 + $0xb8] sm:$0xff] %v1892_v56  ;;  %v1352_v58 = vadd.f32 1.0, %v2372_v52  ;;  %2399 = vpow2.f32 %v1836_v60 }
 0x33f   :  { %v2376_v61 = vpop.eup %2375  ;;  %v1893_v62 = vpack.c.bf16 %v2374_v57, %v2370_v55 }
 0x340   :  { %v2378_v0 = vpop.eup %2377  ;;  %v1353_v53 = vadd.f32 1.0, %v2376_v61  ;;  %2401 = vrcp.f32 %v1352_v58 }
 0x341   :  { %v2380_v1 = vpop.eup %2379  ;;  %1704 = vst [vmem:[#allocation10 + $0xc0] sm:$0xff] %v1893_v62 }
 0x342   :  { %v2382_v2 = vpop.eup %2381  ;;  %2403 = vrcp.f32 %v1353_v53  ;;  %v1354_v59 = vadd.f32 1.0, %v2380_v1 }
 0x343   :  { %v2384_v3 = vpop.eup %2383  ;;  %v1894_v4 = vpack.c.bf16 %v2382_v2, %v2378_v0 }
 0x344   :  { %v2386_v5 = vpop.eup %2385  ;;  %v1355_v6 = vadd.f32 1.0, %v2384_v3  ;;  %2405 = vrcp.f32 %v1354_v59 }
 0x345   :  { %v2388_v7 = vpop.eup %2387  ;;  %1705 = vst [vmem:[#allocation10 + $0xc8] sm:$0xff] %v1894_v4 }
 0x346   :  { %v2390_v8 = vpop.eup %2389  ;;  %2407 = vrcp.f32 %v1355_v6  ;;  %v1356_v9 = vadd.f32 1.0, %v2388_v7 }
 0x347   :  { %v2392_v10 = vpop.eup %2391  ;;  %v1895_v11 = vpack.c.bf16 %v2390_v8, %v2386_v5 }
 0x348   :  { %v2394_v12 = vpop.eup %2393  ;;  %v1357_v13 = vadd.f32 1.0, %v2392_v10  ;;  %2409 = vrcp.f32 %v1356_v9 }
 0x349   :  { %v2396_v14 = vpop.eup %2395  ;;  %1706 = vst [vmem:[#allocation10 + $0xd0] sm:$0xff] %v1895_v11 }
 0x34a   :  { %v2398_v15 = vpop.eup %2397  ;;  %2411 = vrcp.f32 %v1357_v13  ;;  %v1358_v16 = vadd.f32 1.0, %v2396_v14 }
 0x34b   :  { %v2400_v17 = vpop.eup %2399  ;;  %v1896_v18 = vpack.c.bf16 %v2398_v15, %v2394_v12 }
 0x34c   :  { %v1359_v19 = vadd.f32 1.0, %v2400_v17  ;;  %2413 = vrcp.f32 %v1358_v16 }
 0x34d   :  { %1707 = vst [vmem:[#allocation10 + $0xd8] sm:$0xff] %v1896_v18  ;;  %v2402_v20 = vpop.eup %2401 }
 0x34e   :  { %2415 = vrcp.f32 %v1359_v19 }
 0x34f   :  { %v2404_v21 = vpop.eup %2403 }
 0x350   :  { %v1897_v22 = vpack.c.bf16 %v2404_v21, %v2402_v20 }
 0x351   :  { %v2406_v23 = vpop.eup %2405 }
 0x352   :  { %1708 = vst [vmem:[#allocation10 + $0xe0] sm:$0xff] %v1897_v22 }
 0x353   :  { %v2408_v24 = vpop.eup %2407 }
 0x354   :  { %v1898_v25 = vpack.c.bf16 %v2408_v24, %v2406_v23 }
 0x355   :  { %v2410_v26 = vpop.eup %2409 }
 0x356   :  { %1709 = vst [vmem:[#allocation10 + $0xe8] sm:$0xff] %v1898_v25 }
 0x357   :  { %v2412_v27 = vpop.eup %2411 }
 0x358   :  { %v1899_v28 = vpack.c.bf16 %v2412_v27, %v2410_v26 }
 0x359   :  { %v2414_v29 = vpop.eup %2413 }
 0x35a   :  { %1710 = vst [vmem:[#allocation10 + $0xf0] sm:$0xff] %v1899_v28 }
 0x35b   :  { %v2416_v30 = vpop.eup %2415 }
 0x35c   :  { %v1900_v31 = vpack.c.bf16 %v2416_v30, %v2414_v29 }
 0x35e   :  { %1711 = vst [vmem:[#allocation10 + $0xf8] sm:$0xff] %v1900_v31 }
 0x35f   :  { %2508 = shalt.err (!%p2505_p10)
}
 0x360   :  { %1723 = dma.vmem_to_hbm [thread:$0]  %s1718_s27, 4096, %s2772_s7, [#allocation4], %s2533_s21, %s2533_s21, %s2534_s22  }
 0x361   :  { %2523 = dma.done.wait [#allocation4], 4096  }
 0x362   :  { %2524 = vsyncadd [#allocation4], 4294963200 }
 0x363   :  { %1727 = vsyncpa [#allocation3], 1 }
 0x364   :  { %1728 = vsyncpa [#allocation6], 1 }
 0x365   :  { %1729 = vsyncpa [#allocation9], 1 }
 0x366   :  { %1730 = vsyncpa [#allocation4], 1 }

</bundles_post_ra>
